<compile_context>
chip_gen: v6e
topology: v6e:2x2x1
jax: 0.10.0
libtpu: 0.0.40
codegen_flags: <defaults>
</compile_context>

<pallas_src>
import jax
import jax.numpy as jnp
from jax.experimental import pallas as pl
from jax.experimental.pallas import tpu as pltpu

EMBED_DIM = 128


def _dqn_kernel(u_ref, wT_ref, b_ref, w4_ref, o_ref):
    """One batch tile of states.

    u_ref  : (3, TB, E) bf16   stacked embeddings [u_S, u_VmS, u_v]
    wT_ref : (3, E, E)  bf16   fc1/fc2/fc3 weights, pre-transposed (in, out)
    b_ref  : (3, E)     f32    fc1/fc2/fc3 biases
    w4_ref : (4, E)     f32    rows 0..2 = fc4 weight chunks, row 3 = b4 (bcast)
    o_ref  : (TB, 1)    f32    Q-values
    """
    b = b_ref[...]          # (3, E)
    w4 = w4_ref[...]        # (4, E)

    # Three (TB,E) x (E,E) MXU matmuls, f32 accumulation, bias + relu on VPU.
    h1 = jnp.maximum(
        jnp.dot(u_ref[0], wT_ref[0], preferred_element_type=jnp.float32)
        + b[0:1], 0.0)
    h2 = jnp.maximum(
        jnp.dot(u_ref[1], wT_ref[1], preferred_element_type=jnp.float32)
        + b[1:2], 0.0)
    h3 = jnp.maximum(
        jnp.dot(u_ref[2], wT_ref[2], preferred_element_type=jnp.float32)
        + b[2:3], 0.0)

    # fc4 over concat(h1,h2,h3): VPU multiply + lane reduce (no N=1 matmuls).
    q = jnp.sum(h1 * w4[0:1] + h2 * w4[1:2] + h3 * w4[2:3],
                axis=-1, keepdims=True)
    o_ref[...] = q + w4[3:4, 0:1]


def pack_params(params, weight_dtype=jnp.bfloat16):
    """One-time repack of nn.Linear-style params into kernel layout."""
    w1, b1 = params["fc1"]
    w2, b2 = params["fc2"]
    w3, b3 = params["fc3"]
    w4, b4 = params["fc4"]          # w4: (1, 3E), b4: (1,)
    E = w1.shape[0]
    wT = jnp.stack([w1.T, w2.T, w3.T]).astype(weight_dtype)      # (3, E, E)
    b = jnp.stack([b1, b2, b3]).astype(jnp.float32)              # (3, E)
    w4_rows = w4.reshape(3, E).astype(jnp.float32)               # (3, E)
    b4_row = jnp.full((1, E), b4[0], dtype=jnp.float32)          # (1, E)
    w4b4 = jnp.concatenate([w4_rows, b4_row], axis=0)            # (4, E)
    return {"wT": wT, "b": b, "w4b4": w4b4}


def dqn_forward(u_S, u_VmS, u_v, packed):
    """Batched DQN forward.

    u_* : (B, E) (or (E,) for a single pair, like the PyTorch module).
    Returns (B, 1) Q-values, or (1,) for a single pair.
    """
    wT, b, w4b4 = packed["wT"], packed["b"], packed["w4b4"]
    E = wT.shape[-1]

    single = (u_S.ndim == 1)
    if single:
        u_S, u_VmS, u_v = u_S[None], u_VmS[None], u_v[None]
    B = u_S.shape[0]

    # Pack activations: (3, B, E), bf16 for the MXU.
    u = jnp.stack([u_S, u_VmS, u_v]).astype(jnp.bfloat16)

    # Batch tile: 256 fills the v6e/v7x MXU; round small batches to sublanes.
    TB = 256 if B >= 256 else max(8, -(-B // 8) * 8)
    BP = -(-B // TB) * TB
    if BP != B:
        u = jnp.pad(u, ((0, 0), (0, BP - B), (0, 0)))

    out = pl.pallas_call(
        _dqn_kernel,
        out_shape=jax.ShapeDtypeStruct((BP, 1), jnp.float32),
        grid_spec=pltpu.PrefetchScalarGridSpec(
            num_scalar_prefetch=0,
            grid=(BP // TB,),
            in_specs=[
                pl.BlockSpec((3, TB, E), lambda i: (0, i, 0)),   # activations
                pl.BlockSpec((3, E, E), lambda i: (0, 0, 0)),    # resident weights
                pl.BlockSpec((3, E), lambda i: (0, 0)),          # resident biases
                pl.BlockSpec((4, E), lambda i: (0, 0)),          # resident fc4
            ],
            out_specs=pl.BlockSpec((TB, 1), lambda i: (i, 0)),
        ),
        compiler_params=pltpu.CompilerParams(
            dimension_semantics=("parallel",)),
    )(u, wT, b, w4b4)

    if single:
        return out[0]          # (1,)  — matches the PyTorch module's output
    return out[:B]             # (B, 1)


def init_params(key, embed_dim=EMBED_DIM):
    """Deterministic synthetic parameters matching the nn.Linear shapes."""
    ks = jax.random.split(key, 8)

    def lin(kw, kb, out_f, in_f):
        bound = 1.0 / jnp.sqrt(in_f)
        w = jax.random.uniform(kw, (out_f, in_f), jnp.float32, -bound, bound)
        b = jax.random.uniform(kb, (out_f,), jnp.float32, -bound, bound)
        return w, b

    return {
        "fc1": lin(ks[0], ks[1], embed_dim, embed_dim),
        "fc2": lin(ks[2], ks[3], embed_dim, embed_dim),
        "fc3": lin(ks[4], ks[5], embed_dim, embed_dim),
        "fc4": lin(ks[6], ks[7], 1, 3 * embed_dim),
    }


def dqn_reference(u_S, u_VmS, u_v, params):
    """Pure-JAX f32 reference of the PyTorch forward (batched or single)."""
    w1, b1 = params["fc1"]
    w2, b2 = params["fc2"]
    w3, b3 = params["fc3"]
    w4, b4 = params["fc4"]
    h = jnp.concatenate(
        [u_S @ w1.T + b1, u_VmS @ w2.T + b2, u_v @ w3.T + b3], axis=-1)
    h = jnp.maximum(h, 0.0)
    return h @ w4.T + b4


if __name__ == "__main__":
    key = jax.random.PRNGKey(0)
    kp, k1, k2, k3 = jax.random.split(key, 4)
    params = init_params(kp, EMBED_DIM)
    packed = pack_params(params)           # hoisted out of the per-call path

    fwd = jax.jit(dqn_forward)

    # Batched state-action pairs ("should be done in parallel" per the spec);
    # non-multiple of the tile to exercise the padding path.
    B = 300
    u_S = jax.random.normal(k1, (B, EMBED_DIM), jnp.float32)
    u_VmS = jax.random.normal(k2, (B, EMBED_DIM), jnp.float32)
    u_v = jax.random.normal(k3, (B, EMBED_DIM), jnp.float32)

    q = fwd(u_S, u_VmS, u_v, packed)
    jax.block_until_ready(q)
    q_ref = dqn_reference(u_S, u_VmS, u_v, params)
    assert q.shape == (B, 1)
    assert jnp.allclose(q, q_ref, atol=2e-2, rtol=2e-2), (
        float(jnp.max(jnp.abs(q - q_ref))))

    # Single state-action pair — exact PyTorch module signature / output shape.
    q1 = fwd(u_S[0], u_VmS[0], u_v[0], packed)
    jax.block_until_ready(q1)
    q1_ref = dqn_reference(u_S[0], u_VmS[0], u_v[0], params)
    assert q1.shape == (1,)
    assert jnp.allclose(q1, q1_ref, atol=2e-2, rtol=2e-2), (q1, q1_ref)

    print("KERNEL_OK")
</pallas_src>

<mosaic_0001>
module attributes {stable_mosaic.version = 11 : i64} {
  func.func @_dqn_kernel(%arg0: i32, %arg1: memref<3x256x128xbf16, #tpu.memory_space<vmem>>, %arg2: memref<3x128x128xbf16, #tpu.memory_space<vmem>>, %arg3: memref<3x128xf32, #tpu.memory_space<vmem>>, %arg4: memref<4x128xf32, #tpu.memory_space<vmem>>, %arg5: memref<256x1xf32, #tpu.memory_space<vmem>>) attributes {dimension_semantics = [#tpu.dimension_semantics<parallel>], iteration_bounds = array<i64: 2>, scalar_prefetch = 0 : i64, scratch_operands = 0 : i64, tpu.core_type = #tpu.core_type<tc>, window_params = [{transform_indices = @transform_0, window_bounds = array<i64: 3, 256, 128>}, {pipeline_mode = #tpu.pipeline_mode<synchronous>, transform_indices = @transform_1, window_bounds = array<i64: 3, 128, 128>}, {pipeline_mode = #tpu.pipeline_mode<synchronous>, transform_indices = @transform_2, window_bounds = array<i64: 3, 128>}, {pipeline_mode = #tpu.pipeline_mode<synchronous>, transform_indices = @transform_3, window_bounds = array<i64: 4, 128>}, {transform_indices = @transform_4, window_bounds = array<i64: 256, 1>}]} {
    %c0 = arith.constant 0 : index
    %c0_0 = arith.constant 0 : index
    %0 = vector.load %arg3[%c0, %c0_0] : memref<3x128xf32, #tpu.memory_space<vmem>>, vector<3x128xf32>
    %c0_1 = arith.constant 0 : index
    %c0_2 = arith.constant 0 : index
    %1 = vector.load %arg4[%c0_1, %c0_2] : memref<4x128xf32, #tpu.memory_space<vmem>>, vector<4x128xf32>
    %c0_3 = arith.constant 0 : index
    %c0_4 = arith.constant 0 : index
    %c0_5 = arith.constant 0 : index
    %2 = vector.load %arg1[%c0_3, %c0_4, %c0_5] : memref<3x256x128xbf16, #tpu.memory_space<vmem>>, vector<1x256x128xbf16>
    %3 = vector.shape_cast %2 : vector<1x256x128xbf16> to vector<256x128xbf16>
    %c0_6 = arith.constant 0 : index
    %c0_7 = arith.constant 0 : index
    %c0_8 = arith.constant 0 : index
    %4 = vector.load %arg2[%c0_6, %c0_7, %c0_8] : memref<3x128x128xbf16, #tpu.memory_space<vmem>>, vector<1x128x128xbf16>
    %5 = vector.shape_cast %4 : vector<1x128x128xbf16> to vector<128x128xbf16>
    %cst = arith.constant dense<0.000000e+00> : vector<256x128xf32>
    %6 = tpu.matmul %3, %5, %cst {dimension_numbers = #tpu.dot_dimension_numbers<[1], [0], [0], [1], [0, 0, 1, 1], [], []>} : vector<256x128xbf16>, vector<128x128xbf16>, vector<256x128xf32> -> vector<256x128xf32>
    %7 = vector.extract_strided_slice %0 {offsets = [0, 0], sizes = [1, 128], strides = [1, 1]} : vector<3x128xf32> to vector<1x128xf32>
    %8 = vector.broadcast %7 : vector<1x128xf32> to vector<256x128xf32>
    %9 = arith.addf %6, %8 : vector<256x128xf32>
    %cst_9 = arith.constant 0.000000e+00 : f32
    %10 = vector.broadcast %cst_9 : f32 to vector<256x128xf32>
    %11 = arith.maximumf %9, %10 : vector<256x128xf32>
    %c1 = arith.constant 1 : index
    %c0_10 = arith.constant 0 : index
    %c0_11 = arith.constant 0 : index
    %12 = vector.load %arg1[%c1, %c0_10, %c0_11] : memref<3x256x128xbf16, #tpu.memory_space<vmem>>, vector<1x256x128xbf16>
    %13 = vector.shape_cast %12 : vector<1x256x128xbf16> to vector<256x128xbf16>
    %c1_12 = arith.constant 1 : index
    %c0_13 = arith.constant 0 : index
    %c0_14 = arith.constant 0 : index
    %14 = vector.load %arg2[%c1_12, %c0_13, %c0_14] : memref<3x128x128xbf16, #tpu.memory_space<vmem>>, vector<1x128x128xbf16>
    %15 = vector.shape_cast %14 : vector<1x128x128xbf16> to vector<128x128xbf16>
    %cst_15 = arith.constant dense<0.000000e+00> : vector<256x128xf32>
    %16 = tpu.matmul %13, %15, %cst_15 {dimension_numbers = #tpu.dot_dimension_numbers<[1], [0], [0], [1], [0, 0, 1, 1], [], []>} : vector<256x128xbf16>, vector<128x128xbf16>, vector<256x128xf32> -> vector<256x128xf32>
    %17 = vector.extract_strided_slice %0 {offsets = [1, 0], sizes = [1, 128], strides = [1, 1]} : vector<3x128xf32> to vector<1x128xf32>
    %18 = vector.broadcast %17 : vector<1x128xf32> to vector<256x128xf32>
    %19 = arith.addf %16, %18 : vector<256x128xf32>
    %cst_16 = arith.constant 0.000000e+00 : f32
    %20 = vector.broadcast %cst_16 : f32 to vector<256x128xf32>
    %21 = arith.maximumf %19, %20 : vector<256x128xf32>
    %c2 = arith.constant 2 : index
    %c0_17 = arith.constant 0 : index
    %c0_18 = arith.constant 0 : index
    %22 = vector.load %arg1[%c2, %c0_17, %c0_18] : memref<3x256x128xbf16, #tpu.memory_space<vmem>>, vector<1x256x128xbf16>
    %23 = vector.shape_cast %22 : vector<1x256x128xbf16> to vector<256x128xbf16>
    %c2_19 = arith.constant 2 : index
    %c0_20 = arith.constant 0 : index
    %c0_21 = arith.constant 0 : index
    %24 = vector.load %arg2[%c2_19, %c0_20, %c0_21] : memref<3x128x128xbf16, #tpu.memory_space<vmem>>, vector<1x128x128xbf16>
    %25 = vector.shape_cast %24 : vector<1x128x128xbf16> to vector<128x128xbf16>
    %cst_22 = arith.constant dense<0.000000e+00> : vector<256x128xf32>
    %26 = tpu.matmul %23, %25, %cst_22 {dimension_numbers = #tpu.dot_dimension_numbers<[1], [0], [0], [1], [0, 0, 1, 1], [], []>} : vector<256x128xbf16>, vector<128x128xbf16>, vector<256x128xf32> -> vector<256x128xf32>
    %27 = vector.extract_strided_slice %0 {offsets = [2, 0], sizes = [1, 128], strides = [1, 1]} : vector<3x128xf32> to vector<1x128xf32>
    %28 = vector.broadcast %27 : vector<1x128xf32> to vector<256x128xf32>
    %29 = arith.addf %26, %28 : vector<256x128xf32>
    %cst_23 = arith.constant 0.000000e+00 : f32
    %30 = vector.broadcast %cst_23 : f32 to vector<256x128xf32>
    %31 = arith.maximumf %29, %30 : vector<256x128xf32>
    %32 = vector.extract_strided_slice %1 {offsets = [0, 0], sizes = [1, 128], strides = [1, 1]} : vector<4x128xf32> to vector<1x128xf32>
    %33 = vector.broadcast %32 : vector<1x128xf32> to vector<256x128xf32>
    %34 = arith.mulf %11, %33 : vector<256x128xf32>
    %35 = vector.extract_strided_slice %1 {offsets = [1, 0], sizes = [1, 128], strides = [1, 1]} : vector<4x128xf32> to vector<1x128xf32>
    %36 = vector.broadcast %35 : vector<1x128xf32> to vector<256x128xf32>
    %37 = arith.mulf %21, %36 : vector<256x128xf32>
    %38 = arith.addf %34, %37 : vector<256x128xf32>
    %39 = vector.extract_strided_slice %1 {offsets = [2, 0], sizes = [1, 128], strides = [1, 1]} : vector<4x128xf32> to vector<1x128xf32>
    %40 = vector.broadcast %39 : vector<1x128xf32> to vector<256x128xf32>
    %41 = arith.mulf %31, %40 : vector<256x128xf32>
    %42 = arith.addf %38, %41 : vector<256x128xf32>
    %cst_24 = arith.constant dense<0.000000e+00> : vector<256xf32>
    %43 = vector.multi_reduction <add>, %42, %cst_24 [1] : vector<256x128xf32> to vector<256xf32>
    %44 = vector.shape_cast %43 : vector<256xf32> to vector<256x1xf32>
    %45 = vector.extract_strided_slice %1 {offsets = [3, 0], sizes = [1, 1], strides = [1, 1]} : vector<4x128xf32> to vector<1x1xf32>
    %46 = vector.broadcast %45 : vector<1x1xf32> to vector<256x1xf32>
    %47 = arith.addf %44, %46 : vector<256x1xf32>
    %c0_25 = arith.constant 0 : index
    %c0_26 = arith.constant 0 : index
    %48 = vector.load %arg5[%c0_25, %c0_26] : memref<256x1xf32, #tpu.memory_space<vmem>>, vector<256x1xf32>
    tpu.vector_store %arg5[%c0_25, %c0_26], %47 {strides = array<i32>} : memref<256x1xf32, #tpu.memory_space<vmem>>, vector<256x1xf32>,
    return
  }
  func.func @transform_0(%arg0: i32) -> (i32, i32, i32) {
    %c0_i32 = arith.constant 0 : i32
    %c0_i32_0 = arith.constant 0 : i32
    %c0_i32_1 = arith.constant 0 : i32
    return %c0_i32, %arg0, %c0_i32_0 : i32, i32, i32
  }
  func.func @transform_1(%arg0: i32) -> (i32, i32, i32) {
    %c0_i32 = arith.constant 0 : i32
    %c0_i32_0 = arith.constant 0 : i32
    %c0_i32_1 = arith.constant 0 : i32
    %c0_i32_2 = arith.constant 0 : i32
    return %c0_i32, %c0_i32_0, %c0_i32_1 : i32, i32, i32
  }
  func.func @transform_2(%arg0: i32) -> (i32, i32) {
    %c0_i32 = arith.constant 0 : i32
    %c0_i32_0 = arith.constant 0 : i32
    %c0_i32_1 = arith.constant 0 : i32
    return %c0_i32, %c0_i32_0 : i32, i32
  }
  func.func @transform_3(%arg0: i32) -> (i32, i32) {
    %c0_i32 = arith.constant 0 : i32
    %c0_i32_0 = arith.constant 0 : i32
    %c0_i32_1 = arith.constant 0 : i32
    return %c0_i32, %c0_i32_0 : i32, i32
  }
  func.func @transform_4(%arg0: i32) -> (i32, i32) {
    %c0_i32 = arith.constant 0 : i32
    %c0_i32_0 = arith.constant 0 : i32
    return %arg0, %c0_i32 : i32, i32
  }
}

</mosaic_0001>

<bundles_post_ra>
// kernel: dqn_forward.1
= control target key start
LH: loop header
LB: loop body
LE: loop exit
PB: predicated region body
PF: predicated region fallthrough
CT: control target
= control target key end

     0   :  { %s2724_s15 = smov 0   ;;  %s2726_s16 = smov 0   ;;  %s3424_s0 = inlined_call_operand.vmem [shape: bf16[3,512,128], index: 0, kind: input, shape index: {}]   ;;  %s3425_s1 = inlined_call_operand.vmem [shape: bf16[3,128,128], index: 1, kind: input, shape index: {}]   ;;  %s3426_s2 = inlined_call_operand.vmem [shape: f32[3,128], index: 2, kind: input, shape index: {}]   ;;  %s3427_s3 = inlined_call_operand.vmem [shape: f32[4,128], index: 3, kind: input, shape index: {}]   ;;  %s3428_s4 = inlined_call_operand.vmem [shape: f32[512,1], index: 4, kind: output, shape index: {}]  }
   0x1   :  { %s2728_s17 = smov 0  }
   0x2 LB: > { %s2165_s18 = sadd.s32 4294967295, %s2697_s17   ;;  %s2741_s19 = sadd.s32 1, %s2697_s17   ;;  %s2697_s17 = sphi %s2728_s17, %s3431_s17   ;;  %s2693_s16 = sphi %s2726_s16, %s3430_s16   ;;  %s2689_s15 = sphi %s2724_s15, %s3429_s15  }
   0x3   : > { %s18_s20 = ssub.s32 %s2697_s17, %s2741_s19  ;;  %s21_s21 = sadd.s32 1, %s2693_s16 }
   0x4   : > { %p19_p0 = scmp.eq.s32.totalorder %s18_s20, 0  ;;  %p28_p1 = scmp.ne.s32.totalorder %s2693_s16, %s2689_s15 }
   0x5   : > { %p29_p2 = scmp.eq.s32.totalorder %s2697_s17, 0  ;;  %p2168_p4 = scmp.ge.s32.totalorder %s2697_s17, 2 }
   0x6   : > { %s2750_s22 = scalar_select %p19_p0, %s2693_s16, %s21_s21  }
   0x7   : > { %p30_p3 = por %p29_p2, %p28_p1  ;;  %152 = sbr.rel (%p2168_p4) target bundleno = 41 (0x29), region = 28 }
   0xc   : > { %155 = sbr.rel (!%p30_p3) target bundleno = 41 (0x29), region = 32  ;;  %s157_s23 = sand.u32 (%p30_p3), 1, %s2693_s16  }
   0xd   : > { %s2344_s24 = sshll.u32 (%p30_p3), %s2697_s17, 7  ;;  %s2577_s25 = smul.u32 (%p30_p3), 384, %s157_s23 }
   0xe   : > { %s2758_s28 = scalar_lea.vmem (%p30_p3), %s3424_s0, %s2344_s24 }
   0xf   : > { %v179_v0 = vld [vmem:[%s2758_s28] sm:$0xff] (%p30_p3)   ;;  %v183_v1 = vld [vmem:[%s2758_s28 + $0x8] sm:$0xff] (%p30_p3)   ;;  %v187_v2 = vld [vmem:[%s2758_s28 + $0x10] sm:$0xff] (%p30_p3)   ;;  %s2766_s29 = scalar_lea.vmem (%p30_p3), [#allocation2], %s2577_s25 }
  0x10   : > { %v191_v3 = vld [vmem:[%s2758_s28 + $0x18] sm:$0xff] (%p30_p3)   ;;  %v195_v4 = vld [vmem:[%s2758_s28 + $0x20] sm:$0xff] (%p30_p3)   ;;  %v199_v5 = vld [vmem:[%s2758_s28 + $0x28] sm:$0xff] (%p30_p3)   ;;  %180 = vst [vmem:[%s2766_s29] sm:$0xff] (%p30_p3), %v179_v0  }
  0x11   : > { %184 = vst [vmem:[%s2766_s29 + $0x8] sm:$0xff] %v183_v1   ;;  %188 = vst [vmem:[%s2766_s29 + $0x10] sm:$0xff] %v187_v2   ;;  %v203_v6 = vld [vmem:[%s2758_s28 + $0x30] sm:$0xff]   ;;  %v207_v7 = vld [vmem:[%s2758_s28 + $0x38] sm:$0xff]  }
  0x12   : > { %192 = vst [vmem:[%s2766_s29 + $0x18] sm:$0xff] %v191_v3   ;;  %196 = vst [vmem:[%s2766_s29 + $0x20] sm:$0xff] %v195_v4   ;;  %v211_v8 = vld [vmem:[%s2758_s28 + $0x40] sm:$0xff]   ;;  %v215_v9 = vld [vmem:[%s2758_s28 + $0x48] sm:$0xff]  }
  0x13   : > { %200 = vst [vmem:[%s2766_s29 + $0x28] sm:$0xff] %v199_v5   ;;  %204 = vst [vmem:[%s2766_s29 + $0x30] sm:$0xff] %v203_v6   ;;  %v219_v10 = vld [vmem:[%s2758_s28 + $0x50] sm:$0xff]   ;;  %v223_v11 = vld [vmem:[%s2758_s28 + $0x58] sm:$0xff]  }
  0x14   : > { %208 = vst [vmem:[%s2766_s29 + $0x38] sm:$0xff] %v207_v7   ;;  %212 = vst [vmem:[%s2766_s29 + $0x40] sm:$0xff] %v211_v8   ;;  %v227_v12 = vld [vmem:[%s2758_s28 + $0x60] sm:$0xff]   ;;  %v231_v13 = vld [vmem:[%s2758_s28 + $0x68] sm:$0xff]  }
  0x15   : > { %216 = vst [vmem:[%s2766_s29 + $0x48] sm:$0xff] %v215_v9   ;;  %220 = vst [vmem:[%s2766_s29 + $0x50] sm:$0xff] %v219_v10   ;;  %v235_v14 = vld [vmem:[%s2758_s28 + $0x70] sm:$0xff]   ;;  %v239_v15 = vld [vmem:[%s2758_s28 + $0x78] sm:$0xff]  }
  0x16   : > { %224 = vst [vmem:[%s2766_s29 + $0x58] sm:$0xff] %v223_v11   ;;  %228 = vst [vmem:[%s2766_s29 + $0x60] sm:$0xff] %v227_v12   ;;  %v243_v16 = vld [vmem:[%s2758_s28 + $0x100] sm:$0xff]   ;;  %v247_v17 = vld [vmem:[%s2758_s28 + $0x108] sm:$0xff]  }
  0x17   : > { %232 = vst [vmem:[%s2766_s29 + $0x68] sm:$0xff] %v231_v13   ;;  %236 = vst [vmem:[%s2766_s29 + $0x70] sm:$0xff] %v235_v14   ;;  %v251_v18 = vld [vmem:[%s2758_s28 + $0x110] sm:$0xff]   ;;  %v255_v19 = vld [vmem:[%s2758_s28 + $0x118] sm:$0xff]  }
  0x18   : > { %240 = vst [vmem:[%s2766_s29 + $0x78] sm:$0xff] %v239_v15   ;;  %244 = vst [vmem:[%s2766_s29 + $0x80] sm:$0xff] %v243_v16   ;;  %v259_v20 = vld [vmem:[%s2758_s28 + $0x120] sm:$0xff]   ;;  %v263_v21 = vld [vmem:[%s2758_s28 + $0x128] sm:$0xff]  }
  0x19   : > { %248 = vst [vmem:[%s2766_s29 + $0x88] sm:$0xff] %v247_v17   ;;  %252 = vst [vmem:[%s2766_s29 + $0x90] sm:$0xff] %v251_v18   ;;  %v267_v22 = vld [vmem:[%s2758_s28 + $0x130] sm:$0xff]   ;;  %v271_v23 = vld [vmem:[%s2758_s28 + $0x138] sm:$0xff]  }
  0x1a   : > { %256 = vst [vmem:[%s2766_s29 + $0x98] sm:$0xff] %v255_v19   ;;  %260 = vst [vmem:[%s2766_s29 + $0xa0] sm:$0xff] %v259_v20   ;;  %v275_v24 = vld [vmem:[%s2758_s28 + $0x140] sm:$0xff]   ;;  %v279_v25 = vld [vmem:[%s2758_s28 + $0x148] sm:$0xff]  }
  0x1b   : > { %264 = vst [vmem:[%s2766_s29 + $0xa8] sm:$0xff] %v263_v21   ;;  %268 = vst [vmem:[%s2766_s29 + $0xb0] sm:$0xff] %v267_v22   ;;  %v283_v26 = vld [vmem:[%s2758_s28 + $0x150] sm:$0xff]   ;;  %v287_v27 = vld [vmem:[%s2758_s28 + $0x158] sm:$0xff]  }
  0x1c   : > { %272 = vst [vmem:[%s2766_s29 + $0xb8] sm:$0xff] %v271_v23   ;;  %276 = vst [vmem:[%s2766_s29 + $0xc0] sm:$0xff] %v275_v24   ;;  %v291_v28 = vld [vmem:[%s2758_s28 + $0x160] sm:$0xff]   ;;  %v295_v29 = vld [vmem:[%s2758_s28 + $0x168] sm:$0xff]  }
  0x1d   : > { %280 = vst [vmem:[%s2766_s29 + $0xc8] sm:$0xff] %v279_v25   ;;  %284 = vst [vmem:[%s2766_s29 + $0xd0] sm:$0xff] %v283_v26   ;;  %v299_v30 = vld [vmem:[%s2758_s28 + $0x170] sm:$0xff]   ;;  %v303_v31 = vld [vmem:[%s2758_s28 + $0x178] sm:$0xff]  }
  0x1e   : > { %288 = vst [vmem:[%s2766_s29 + $0xd8] sm:$0xff] %v287_v27   ;;  %292 = vst [vmem:[%s2766_s29 + $0xe0] sm:$0xff] %v291_v28   ;;  %v307_v32 = vld [vmem:[%s2758_s28 + $0x200] sm:$0xff]   ;;  %v311_v33 = vld [vmem:[%s2758_s28 + $0x208] sm:$0xff]  }
  0x1f   : > { %296 = vst [vmem:[%s2766_s29 + $0xe8] sm:$0xff] %v295_v29   ;;  %300 = vst [vmem:[%s2766_s29 + $0xf0] sm:$0xff] %v299_v30   ;;  %v315_v34 = vld [vmem:[%s2758_s28 + $0x210] sm:$0xff]   ;;  %v319_v35 = vld [vmem:[%s2758_s28 + $0x218] sm:$0xff]  }
  0x20   : > { %304 = vst [vmem:[%s2766_s29 + $0xf8] sm:$0xff] %v303_v31   ;;  %308 = vst [vmem:[%s2766_s29 + $0x100] sm:$0xff] %v307_v32   ;;  %v323_v36 = vld [vmem:[%s2758_s28 + $0x220] sm:$0xff]   ;;  %v327_v37 = vld [vmem:[%s2758_s28 + $0x228] sm:$0xff]  }
  0x21   : > { %312 = vst [vmem:[%s2766_s29 + $0x108] sm:$0xff] %v311_v33   ;;  %316 = vst [vmem:[%s2766_s29 + $0x110] sm:$0xff] %v315_v34   ;;  %v331_v38 = vld [vmem:[%s2758_s28 + $0x230] sm:$0xff]   ;;  %v335_v39 = vld [vmem:[%s2758_s28 + $0x238] sm:$0xff]  }
  0x22   : > { %320 = vst [vmem:[%s2766_s29 + $0x118] sm:$0xff] %v319_v35   ;;  %324 = vst [vmem:[%s2766_s29 + $0x120] sm:$0xff] %v323_v36   ;;  %v339_v40 = vld [vmem:[%s2758_s28 + $0x240] sm:$0xff]   ;;  %v343_v41 = vld [vmem:[%s2758_s28 + $0x248] sm:$0xff]  }
  0x23   : > { %328 = vst [vmem:[%s2766_s29 + $0x128] sm:$0xff] %v327_v37   ;;  %332 = vst [vmem:[%s2766_s29 + $0x130] sm:$0xff] %v331_v38   ;;  %v347_v42 = vld [vmem:[%s2758_s28 + $0x250] sm:$0xff]   ;;  %v351_v43 = vld [vmem:[%s2758_s28 + $0x258] sm:$0xff]  }
  0x24   : > { %336 = vst [vmem:[%s2766_s29 + $0x138] sm:$0xff] %v335_v39   ;;  %340 = vst [vmem:[%s2766_s29 + $0x140] sm:$0xff] %v339_v40   ;;  %v355_v44 = vld [vmem:[%s2758_s28 + $0x260] sm:$0xff]   ;;  %v359_v45 = vld [vmem:[%s2758_s28 + $0x268] sm:$0xff]  }
  0x25   : > { %344 = vst [vmem:[%s2766_s29 + $0x148] sm:$0xff] %v343_v41   ;;  %348 = vst [vmem:[%s2766_s29 + $0x150] sm:$0xff] %v347_v42   ;;  %v363_v46 = vld [vmem:[%s2758_s28 + $0x270] sm:$0xff]   ;;  %v367_v47 = vld [vmem:[%s2758_s28 + $0x278] sm:$0xff]  }
  0x26   : > { %352 = vst [vmem:[%s2766_s29 + $0x158] sm:$0xff] %v351_v43   ;;  %356 = vst [vmem:[%s2766_s29 + $0x160] sm:$0xff] %v355_v44  }
  0x27   : > { %360 = vst [vmem:[%s2766_s29 + $0x168] sm:$0xff] %v359_v45   ;;  %364 = vst [vmem:[%s2766_s29 + $0x170] sm:$0xff] %v363_v46  }
  0x28   : > { %368 = vst [vmem:[%s2766_s29 + $0x178] sm:$0xff] %v367_v47  }
  0x29 PF: > { %p2171_p5 = scmp.ge.s32.totalorder %s2697_s17, 1  ;;  %p585_p6 = scmp.lt.s32.totalorder %s2697_s17, 3 }
  0x2b   : > { %p586_p7 = pnand %p2171_p5, %p585_p6 }
  0x2c   : > { %s592_s6 = sand.u32 (!%p586_p7), 1, %s2689_s15   ;;  %s2172_s23 = sshll.u32 (!%p586_p7), %s2165_s18, 5 }
  0x2d   : > { %589 = sbr.rel (%p586_p7) target bundleno = 526 (0x20e), region = 73  ;;  %p619_p8 = scmp.lt.s32.totalorder (!%p586_p7), %s2172_s23, 63 }
  0x2e   : > { %s2578_s9 = smul.u32 (!%p586_p7), 384, %s592_s6 }
  0x30   : > { %s2873_s14 = scalar_lea.vmem (!%p586_p7), [#allocation2], %s2578_s9 }
  0x32   : > { %v2603_v48 = vld [vmem:[%s3425_s1 + $0x38] sm:$0xff]   ;;  %v2604_v49 = vld [vmem:[%s3425_s1 + $0x30] sm:$0xff]   ;;  %v2605_v50 = vld [vmem:[%s3425_s1 + $0x28] sm:$0xff]   ;;  %s3433_s23 = smov (!%p619_p8, %s2172_s23), 63  ;;  %vm2070_vm0 = vcmask 7168  }
  0x33   : > { %2417 = vmatprep.subr.bf16.mxu0 %v2603_v48  ;;  %2561 = vmatprep.subr.bf16.mxu1 %v2603_v48  ;;  %v2606_v51 = vld [vmem:[%s3425_s1 + $0x20] sm:$0xff]   ;;  %v2607_v54 = vld [vmem:[%s3425_s1 + $0x18] sm:$0xff]   ;;  %v2608_v55 = vld [vmem:[%s3425_s1 + $0x10] sm:$0xff]   ;;  %s2173_s24 = sshll.u32 %s3433_s23, 3 }
  0x34   : > { %2418 = vmatpush3.bf16.msra.mxu0 %v2603_v48  ;;  %2569 = vmatpush3.bf16.msra.mxu1 %v2603_v48  ;;  %v2611_v52 = vld [vmem:[%s2873_s14] sm:$0xff]   ;;  %v2609_v56 = vld [vmem:[%s3425_s1 + $0x8] sm:$0xff]   ;;  %v2615_v58 = vld [vmem:[%s3425_s1 + $0x78] sm:$0xff]   ;;  %s3316_s27 = scalar_lea.vmem %s3428_s4, %s2173_s24 }
  0x35   : > { %2419 = vmatprep.subr.bf16.mxu0 %v2604_v49  ;;  %2562 = vmatprep.subr.bf16.mxu1 %v2604_v49  ;;  %v2612_v53 = vld [vmem:[%s2873_s14 + $0x40] sm:$0xff]   ;;  %v2613_v59 = vld [vmem:[%s2873_s14 + $0x8] sm:$0xff]   ;;  %v2616_v60 = vld [vmem:[%s3425_s1 + $0xb8] sm:$0xff]  }
  0x36   : > { %2433 = vmatprep.mubr.bf16.mxu0 %v2611_v52  ;;  %2449 = vmatprep.mubr.bf16.mxu1 %v2612_v53  ;;  %v2610_v57 = vld [vmem:[%s3425_s1] sm:$0xff]   ;;  %v2614_v61 = vld [vmem:[%s2873_s14 + $0x48] sm:$0xff]   ;;  %v2617_v62 = vld [vmem:[%s3425_s1 + $0x70] sm:$0xff]  }
  0x37   : > { %v2618_v63 = vld [vmem:[%s3425_s1 + $0xb0] sm:$0xff]   ;;  %v2623_v2 = vld [vmem:[%s3425_s1 + $0x68] sm:$0xff]   ;;  %v2621_v3 = vld [vmem:[%s2873_s14 + $0x18] sm:$0xff]  }
  0x38   : > { %2420 = vmatpush3.bf16.msra.mxu0 %v2604_v49  ;;  %2570 = vmatpush3.bf16.msra.mxu1 %v2604_v49  ;;  %v2619_v0 = vld [vmem:[%s2873_s14 + $0x10] sm:$0xff]   ;;  %v2624_v4 = vld [vmem:[%s3425_s1 + $0xa8] sm:$0xff]   ;;  %v2622_v5 = vld [vmem:[%s2873_s14 + $0x58] sm:$0xff]  }
  0x39   : > { %2421 = vmatprep.subr.bf16.mxu0 %v2605_v50  ;;  %2563 = vmatprep.subr.bf16.mxu1 %v2605_v50  ;;  %v2620_v1 = vld [vmem:[%s2873_s14 + $0x50] sm:$0xff]   ;;  %v2625_v6 = vld [vmem:[%s3425_s1 + $0x60] sm:$0xff]   ;;  %v2631_v10 = vld [vmem:[%s3425_s1 + $0x58] sm:$0xff]  }
  0x3a   : > { %v2626_v7 = vld [vmem:[%s3425_s1 + $0xa0] sm:$0xff]   ;;  %v2629_v11 = vld [vmem:[%s2873_s14 + $0x28] sm:$0xff]   ;;  %v2632_v12 = vld [vmem:[%s3425_s1 + $0x98] sm:$0xff]  }
  0x3b   : > { %v2627_v8 = vld [vmem:[%s2873_s14 + $0x20] sm:$0xff]   ;;  %v2630_v13 = vld [vmem:[%s2873_s14 + $0x68] sm:$0xff]   ;;  %v2633_v14 = vld [vmem:[%s3425_s1 + $0x50] sm:$0xff]  }
  0x3c   : > { %2422 = vmatpush3.bf16.msra.mxu0 %v2605_v50  ;;  %2571 = vmatpush3.bf16.msra.mxu1 %v2605_v50  ;;  %v2628_v9 = vld [vmem:[%s2873_s14 + $0x60] sm:$0xff]   ;;  %v2634_v15 = vld [vmem:[%s3425_s1 + $0x90] sm:$0xff]   ;;  %v2639_v18 = vld [vmem:[%s3425_s1 + $0x48] sm:$0xff]  }
  0x3d   : > { %2423 = vmatprep.subr.bf16.mxu0 %v2606_v51  ;;  %2564 = vmatprep.subr.bf16.mxu1 %v2606_v51  ;;  %v2635_v16 = vld [vmem:[%s2873_s14 + $0x30] sm:$0xff]   ;;  %v2637_v19 = vld [vmem:[%s2873_s14 + $0x38] sm:$0xff]   ;;  %v2640_v20 = vld [vmem:[%s3425_s1 + $0x88] sm:$0xff]  }
  0x3e   : > { %v2636_v17 = vld [vmem:[%s2873_s14 + $0x70] sm:$0xff]   ;;  %v2638_v21 = vld [vmem:[%s2873_s14 + $0x78] sm:$0xff]   ;;  %v2641_v22 = vld [vmem:[%s3425_s1 + $0x40] sm:$0xff]  }
  0x3f   : > { %v2642_v23 = vld [vmem:[%s3425_s1 + $0x80] sm:$0xff]   ;;  %v2645_v26 = vld [vmem:[%s2873_s14 + $0x88] sm:$0xff]   ;;  %v2647_v28 = vld [vmem:[%s2873_s14 + $0x90] sm:$0xff]  }
  0x40   : > { %2424 = vmatpush3.bf16.msra.mxu0 %v2606_v51  ;;  %2572 = vmatpush3.bf16.msra.mxu1 %v2606_v51  ;;  %v2643_v24 = vld [vmem:[%s2873_s14 + $0x80] sm:$0xff]   ;;  %v2646_v27 = vld [vmem:[%s2873_s14 + $0x108] sm:$0xff]   ;;  %v2648_v29 = vld [vmem:[%s2873_s14 + $0x110] sm:$0xff]  }
  0x41   : > { %2425 = vmatprep.subr.bf16.mxu0 %v2607_v54  ;;  %2565 = vmatprep.subr.bf16.mxu1 %v2607_v54  ;;  %v2644_v25 = vld [vmem:[%s2873_s14 + $0x100] sm:$0xff]   ;;  %v2649_v30 = vld [vmem:[%s2873_s14 + $0x98] sm:$0xff]   ;;  %v2653_v34 = vld [vmem:[%s2873_s14 + $0xa8] sm:$0xff]  }
  0x42   : > { %v2650_v31 = vld [vmem:[%s2873_s14 + $0x118] sm:$0xff]   ;;  %v2651_v32 = vld [vmem:[%s2873_s14 + $0xa0] sm:$0xff]   ;;  %v2654_v35 = vld [vmem:[%s2873_s14 + $0x128] sm:$0xff]  }
  0x43   : > { %v2652_v33 = vld [vmem:[%s2873_s14 + $0x120] sm:$0xff]   ;;  %v2655_v36 = vld [vmem:[%s2873_s14 + $0xb0] sm:$0xff]   ;;  %v2657_v38 = vld [vmem:[%s2873_s14 + $0xb8] sm:$0xff]  }
  0x44   : > { %2426 = vmatpush3.bf16.msra.mxu0 %v2607_v54  ;;  %2573 = vmatpush3.bf16.msra.mxu1 %v2607_v54  ;;  %v2656_v37 = vld [vmem:[%s2873_s14 + $0x130] sm:$0xff]   ;;  %v2658_v39 = vld [vmem:[%s2873_s14 + $0x138] sm:$0xff]   ;;  %v2659_v40 = vld [vmem:[%s2873_s14 + $0xc0] sm:$0xff]  }
  0x45   : > { %2427 = vmatprep.subr.bf16.mxu0 %v2608_v55  ;;  %2566 = vmatprep.subr.bf16.mxu1 %v2608_v55  ;;  %v2660_v41 = vld [vmem:[%s2873_s14 + $0x140] sm:$0xff]   ;;  %v2661_v42 = vld [vmem:[%s2873_s14 + $0xc8] sm:$0xff]   ;;  %v2663_v44 = vld [vmem:[%s2873_s14 + $0xd0] sm:$0xff]  }
  0x46   : > { %v2662_v43 = vld [vmem:[%s2873_s14 + $0x148] sm:$0xff]   ;;  %v2664_v45 = vld [vmem:[%s2873_s14 + $0x150] sm:$0xff]   ;;  %v2665_v46 = vld [vmem:[%s2873_s14 + $0xd8] sm:$0xff]  }
  0x47   : > { %v2666_v47 = vld [vmem:[%s2873_s14 + $0x158] sm:$0xff]   ;;  %v2667_v48 = vld [vmem:[%s2873_s14 + $0xe0] sm:$0xff]   ;;  %v2669_v50 = vld [vmem:[%s2873_s14 + $0xe8] sm:$0xff]  }
  0x48   : > { %2428 = vmatpush3.bf16.msra.mxu0 %v2608_v55  ;;  %2574 = vmatpush3.bf16.msra.mxu1 %v2608_v55  ;;  %v2668_v49 = vld [vmem:[%s2873_s14 + $0x160] sm:$0xff]   ;;  %v2670_v51 = vld [vmem:[%s2873_s14 + $0x168] sm:$0xff]   ;;  %v2671_v52 = vld [vmem:[%s2873_s14 + $0xf0] sm:$0xff]  }
  0x49   : > { %2429 = vmatprep.subr.bf16.mxu0 %v2609_v56  ;;  %2567 = vmatprep.subr.bf16.mxu1 %v2609_v56  ;;  %v2672_v53 = vld [vmem:[%s2873_s14 + $0x170] sm:$0xff]   ;;  %v2673_v54 = vld [vmem:[%s2873_s14 + $0xf8] sm:$0xff]  }
  0x4a   : > { %v2674_v55 = vld [vmem:[%s2873_s14 + $0x178] sm:$0xff]  }
  0x4c   : > { %2430 = vmatpush3.bf16.msra.mxu0 %v2609_v56  ;;  %2575 = vmatpush3.bf16.msra.mxu1 %v2609_v56  ;;  %v675_v56 = vlaneseq }
  0x4d   : > { %2431 = vmatprep.subr.bf16.mxu0 %v2610_v57  ;;  %2568 = vmatprep.subr.bf16.mxu1 %v2610_v57 }
  0x50   : > { %2432 = vmatpush3.bf16.msra.mxu0 %v2610_v57  ;;  %2576 = vmatpush3.bf16.msra.mxu1 %v2610_v57  ;;  %v2983_v57 = vshrl.u32 %v675_v56, 7 }
  0x51   : > { %2465 = vmatprep.subr.bf16.mxu1 %v2615_v58  ;;  %2513 = vmatprep.subr.bf16.mxu0 %v2616_v60 }
  0x53   : > { %2434 = vmatmul.mubr.bf16.vlgmr.msra.gmra.mxu0 %v2613_v59  ;;  %2450 = vmatmul.mubr.bf16.vlgmr.msra.gmra.mxu1 %v2614_v61 }
  0x54   : > { %2466 = vmatpush3.bf16.msra.mxu1 %v2615_v58  ;;  %2514 = vmatpush3.bf16.msra.mxu0 %v2616_v60 }
  0x55   : > { %2467 = vmatprep.subr.bf16.mxu1 %v2617_v62  ;;  %2515 = vmatprep.subr.bf16.mxu0 %v2618_v63 }
  0x56   : > { %2437 = vmatprep.mubr.bf16.mxu0 %v2619_v0  ;;  %2453 = vmatprep.mubr.bf16.mxu1 %v2620_v1 }
  0x58   : > { %2468 = vmatpush3.bf16.msra.mxu1 %v2617_v62  ;;  %2516 = vmatpush3.bf16.msra.mxu0 %v2618_v63  ;;  %v677_v62 = vsub.s32 0, %v2983_v57  ;;  %v625_v63 = vld [vmem:[%s3426_s2] sm:$0x7] }
  0x59   : > { %2469 = vmatprep.subr.bf16.mxu1 %v2623_v2  ;;  %2517 = vmatprep.subr.bf16.mxu0 %v2624_v4 }
  0x5b   : > { %2438 = vmatmul.mubr.bf16.gmra.mxu0 %v2621_v3  ;;  %2454 = vmatmul.mubr.bf16.gmra.mxu1 %v2622_v5 }
  0x5c   : > { %2470 = vmatpush3.bf16.msra.mxu1 %v2623_v2  ;;  %2518 = vmatpush3.bf16.msra.mxu0 %v2624_v4  ;;  %v2989_v4 = vrot.slane %v625_v63, %v677_v62 }
  0x5d   : > { %2471 = vmatprep.subr.bf16.mxu1 %v2625_v6  ;;  %2519 = vmatprep.subr.bf16.mxu0 %v2626_v7 }
  0x5e   : > { %2441 = vmatprep.mubr.bf16.mxu0 %v2627_v8  ;;  %2457 = vmatprep.mubr.bf16.mxu1 %v2628_v9 }
  0x60   : > { %2472 = vmatpush3.bf16.msra.mxu1 %v2625_v6  ;;  %2520 = vmatpush3.bf16.msra.mxu0 %v2626_v7 }
  0x61   : > { %2473 = vmatprep.subr.bf16.mxu1 %v2631_v10  ;;  %2521 = vmatprep.subr.bf16.mxu0 %v2632_v12 }
  0x63   : > { %2442 = vmatmul.mubr.bf16.gmra.mxu0 %v2629_v11  ;;  %2458 = vmatmul.mubr.bf16.gmra.mxu1 %v2630_v13  ;;  %v2996_v11 = vld [vmem:[%s3427_s3] sm:$0xf] }
  0x64   : > { %2474 = vmatpush3.bf16.msra.mxu1 %v2631_v10  ;;  %2522 = vmatpush3.bf16.msra.mxu0 %v2632_v12  ;;  %v1068_v10 = vsub.s32 1, %v2983_v57 }
  0x65   : > { %2475 = vmatprep.subr.bf16.mxu1 %v2633_v14  ;;  %2523 = vmatprep.subr.bf16.mxu0 %v2634_v15 }
  0x66   : > { %2445 = vmatprep.mubr.bf16.mxu0 %v2635_v16  ;;  %2461 = vmatprep.mubr.bf16.mxu1 %v2636_v17 }
  0x68   : > { %2476 = vmatpush3.bf16.msra.mxu1 %v2633_v14  ;;  %2524 = vmatpush3.bf16.msra.mxu0 %v2634_v15 }
  0x69   : > { %2477 = vmatprep.subr.bf16.mxu1 %v2639_v18  ;;  %2525 = vmatprep.subr.bf16.mxu0 %v2640_v20 }
  0x6b   : > { %2446 = vmatmul.mubr.bf16.gmra.mxu0 %v2637_v19  ;;  %2462 = vmatmul.mubr.bf16.gmra.mxu1 %v2638_v21  ;;  %v3005_v21 = vrot.slane %v2996_v11, %v677_v62 }
  0x6c   : > { %2478 = vmatpush3.bf16.msra.mxu1 %v2639_v18  ;;  %2526 = vmatpush3.bf16.msra.mxu0 %v2640_v20  ;;  %v1459_v18 = vsub.s32 2, %v2983_v57 }
  0x6d   : > { %2479 = vmatprep.subr.bf16.mxu1 %v2641_v22  ;;  %2527 = vmatprep.subr.bf16.mxu0 %v2642_v23 }
  0x6e   : > { %2481 = vmatprep.mubr.bf16.mxu1 %v2643_v24  ;;  %2529 = vmatprep.mubr.bf16.mxu0 %v2644_v25  ;;  %v3008_v25 = vrot.slane %v625_v63, %v1068_v10 }
  0x70   : > { %2480 = vmatpush3.bf16.msra.mxu1 %v2641_v22  ;;  %2528 = vmatpush3.bf16.msra.mxu0 %v2642_v23 }
  0x73   : > { %2482 = vmatmul.mubr.bf16.vlgmr.msra.gmra.mxu1 %v2645_v26  ;;  %2530 = vmatmul.mubr.bf16.vlgmr.msra.gmra.mxu0 %v2646_v27 }
  0x74   : > { %2485 = vmatprep.mubr.bf16.mxu1 %v2647_v28  ;;  %2533 = vmatprep.mubr.bf16.mxu0 %v2648_v29 }
  0x7b   : > { %2486 = vmatmul.mubr.bf16.gmra.mxu1 %v2649_v30  ;;  %2534 = vmatmul.mubr.bf16.gmra.mxu0 %v2650_v31 }
  0x7c   : > { %2489 = vmatprep.mubr.bf16.mxu1 %v2651_v32  ;;  %2537 = vmatprep.mubr.bf16.mxu0 %v2652_v33 }
  0x83   : > { %2490 = vmatmul.mubr.bf16.gmra.mxu1 %v2653_v34  ;;  %2538 = vmatmul.mubr.bf16.gmra.mxu0 %v2654_v35  ;;  %v3013_v34 = vrot.slane %v2996_v11, %v1068_v10  ;;  %v3015_v35 = vrot.slane %v625_v63, %v1459_v18 }
  0x84   : > { %2493 = vmatprep.mubr.bf16.mxu1 %v2655_v36  ;;  %2541 = vmatprep.mubr.bf16.mxu0 %v2656_v37 }
  0x8b   : > { %2494 = vmatmul.mubr.bf16.gmra.mxu1 %v2657_v38  ;;  %2542 = vmatmul.mubr.bf16.gmra.mxu0 %v2658_v39  ;;  %v3022_v39 = vrot.slane %v2996_v11, %v1459_v18 }
  0x8c   : > { %2497 = vmatprep.mubr.bf16.mxu1 %v2659_v40  ;;  %2545 = vmatprep.mubr.bf16.mxu0 %v2660_v41 }
  0x93   : > { %2498 = vmatmul.mubr.bf16.gmra.mxu1 %v2661_v42  ;;  %2546 = vmatmul.mubr.bf16.gmra.mxu0 %v2662_v43 }
  0x94   : > { %2501 = vmatprep.mubr.bf16.mxu1 %v2663_v44  ;;  %2549 = vmatprep.mubr.bf16.mxu0 %v2664_v45 }
  0x9b   : > { %2502 = vmatmul.mubr.bf16.gmra.mxu1 %v2665_v46  ;;  %2550 = vmatmul.mubr.bf16.gmra.mxu0 %v2666_v47 }
  0x9c   : > { %2505 = vmatprep.mubr.bf16.mxu1 %v2667_v48  ;;  %2553 = vmatprep.mubr.bf16.mxu0 %v2668_v49 }
  0xa3   : > { %2506 = vmatmul.mubr.bf16.gmra.mxu1 %v2669_v50  ;;  %2554 = vmatmul.mubr.bf16.gmra.mxu0 %v2670_v51 }
  0xa4   : > { %2509 = vmatprep.mubr.bf16.mxu1 %v2671_v52  ;;  %2557 = vmatprep.mubr.bf16.mxu0 %v2672_v53 }
  0xab   : > { %2510 = vmatmul.mubr.bf16.gmra.mxu1 %v2673_v54  ;;  %2558 = vmatmul.mubr.bf16.gmra.mxu0 %v2674_v55 }
 0x113   : > { %v2435_v58 = vpop.f32.mrf.mxu0  ;;  %v2451_v59 = vpop.f32.mrf.mxu1 }
 0x114   : > { %v866_v7 = vadd.f32 %v2435_v58, %v2989_v4  ;;  %v930_v12 = vadd.f32 %v2451_v59, %v2989_v4 }
 0x115   : > { %v857_v60 = vpop.f32.mrf.mxu0  ;;  %v921_v61 = vpop.f32.mrf.mxu1 }
 0x116   : > { %v858_v13 = vadd.f32 %v857_v60, %v2989_v4  ;;  %v922_v14 = vadd.f32 %v921_v61, %v2989_v4  ;;  %v986_v19 = vmax.f32 %v866_v7, 0.0  ;;  %v1002_v26 = vmax.f32 %v930_v12, 0.0 }
 0x117   : > { %v2436_v0 = vpop.f32.mrf.mxu0  ;;  %v2452_v1 = vpop.f32.mrf.mxu1 }
 0x118   : > { %v869_v15 = vadd.f32 %v2436_v0, %v2989_v4  ;;  %v933_v20 = vadd.f32 %v2452_v1, %v2989_v4  ;;  %v984_v27 = vmax.f32 %v858_v13, 0.0  ;;  %v1000_v30 = vmax.f32 %v922_v14, 0.0 }
 0x119   : > { %v860_v2 = vpop.f32.mrf.mxu0  ;;  %v924_v3 = vpop.f32.mrf.mxu1  ;;  %v3018_v36 = vmul.f32 %v3005_v21, %v986_v19  ;;  %v3028_v46 = vmul.f32 %v3005_v21, %v1002_v26 }
 0x11a   : > { %v861_v22 = vadd.f32 %v860_v2, %v2989_v4  ;;  %v925_v28 = vadd.f32 %v924_v3, %v2989_v4  ;;  %v987_v31 = vmax.f32 %v869_v15, 0.0  ;;  %v1003_v37 = vmax.f32 %v933_v20, 0.0 }
 0x11b   : > { %v2439_v5 = vpop.f32.mrf.mxu0  ;;  %v2455_v6 = vpop.f32.mrf.mxu1  ;;  %v3031_v47 = vmul.f32 %v3005_v21, %v984_v27  ;;  %v3034_v50 = vmul.f32 %v3005_v21, %v1000_v30 }
 0x11c   : > { %v882_v29 = vadd.f32 %v2439_v5, %v2989_v4  ;;  %v946_v38 = vadd.f32 %v2455_v6, %v2989_v4  ;;  %v985_v40 = vmax.f32 %v861_v22, 0.0  ;;  %v1001_v48 = vmax.f32 %v925_v28, 0.0 }
 0x11d   : > { %v873_v8 = vpop.f32.mrf.mxu0  ;;  %v937_v9 = vpop.f32.mrf.mxu1  ;;  %v3037_v51 = vmul.f32 %v3005_v21, %v987_v31  ;;  %v3042_v56 = vmul.f32 %v3005_v21, %v1003_v37 }
 0x11e   : > { %v874_v41 = vadd.f32 %v873_v8, %v2989_v4  ;;  %v938_v42 = vadd.f32 %v937_v9, %v2989_v4  ;;  %v990_v49 = vmax.f32 %v882_v29, 0.0  ;;  %v1006_v58 = vmax.f32 %v946_v38, 0.0 }
 0x11f   : > { %v2440_v16 = vpop.f32.mrf.mxu0  ;;  %v2456_v17 = vpop.f32.mrf.mxu1  ;;  %v3047_v61 = vmul.f32 %v3005_v21, %v985_v40  ;;  %v3050_v3 = vmul.f32 %v3005_v21, %v1001_v48 }
 0x120   : > { %v885_v43 = vadd.f32 %v2440_v16, %v2989_v4  ;;  %v949_v52 = vadd.f32 %v2456_v17, %v2989_v4  ;;  %v988_v62 = vmax.f32 %v874_v41, 0.0  ;;  %v1004_v63 = vmax.f32 %v938_v42, 0.0 }
 0x121   : > { %v876_v23 = vpop.f32.mrf.mxu0  ;;  %v940_v24 = vpop.f32.mrf.mxu1  ;;  %v3053_v5 = vmul.f32 %v3005_v21, %v990_v49  ;;  %v3060_v15 = vmul.f32 %v3005_v21, %v1006_v58 }
 0x122   : > { %v877_v53 = vadd.f32 %v876_v23, %v2989_v4  ;;  %v941_v59 = vadd.f32 %v940_v24, %v2989_v4  ;;  %v991_v0 = vmax.f32 %v885_v43, 0.0  ;;  %v1007_v8 = vmax.f32 %v949_v52, 0.0 }
 0x123   : > { %v2443_v32 = vpop.f32.mrf.mxu0  ;;  %v2459_v33 = vpop.f32.mrf.mxu1  ;;  %v3064_v19 = vmul.f32 %v3005_v21, %v988_v62  ;;  %v3067_v20 = vmul.f32 %v3005_v21, %v1004_v63 }
 0x124   : > { %v898_v60 = vadd.f32 %v2443_v32, %v2989_v4  ;;  %v962_v6 = vadd.f32 %v2459_v33, %v2989_v4  ;;  %v989_v9 = vmax.f32 %v877_v53, 0.0  ;;  %v1005_v16 = vmax.f32 %v941_v59, 0.0 }
 0x125   : > { %v889_v44 = vpop.f32.mrf.mxu0  ;;  %v953_v45 = vpop.f32.mrf.mxu1  ;;  %v3070_v22 = vmul.f32 %v3005_v21, %v991_v0  ;;  %v3076_v31 = vmul.f32 %v3005_v21, %v1007_v8 }
 0x126   : > { %v890_v7 = vadd.f32 %v889_v44, %v2989_v4  ;;  %v954_v10 = vadd.f32 %v953_v45, %v2989_v4  ;;  %v994_v17 = vmax.f32 %v898_v60, 0.0  ;;  %v1010_v27 = vmax.f32 %v962_v6, 0.0 }
 0x127   : > { %v2444_v54 = vpop.f32.mrf.mxu0  ;;  %v2460_v55 = vpop.f32.mrf.mxu1  ;;  %v3079_v32 = vmul.f32 %v3005_v21, %v989_v9  ;;  %v3082_v41 = vmul.f32 %v3005_v21, %v1005_v16 }
 0x128   : > { %v901_v12 = vadd.f32 %v2444_v54, %v2989_v4  ;;  %v965_v18 = vadd.f32 %v2460_v55, %v2989_v4  ;;  %v992_v28 = vmax.f32 %v890_v7, 0.0  ;;  %v1008_v33 = vmax.f32 %v954_v10, 0.0 }
 0x129   : > { %v892_v1 = vpop.f32.mrf.mxu0  ;;  %v956_v2 = vpop.f32.mrf.mxu1  ;;  %v3085_v42 = vmul.f32 %v3005_v21, %v994_v17  ;;  %v3096_v55 = vmul.f32 %v3005_v21, %v1010_v27 }
 0x12a   : > { %v893_v23 = vadd.f32 %v892_v1, %v2989_v4  ;;  %v957_v29 = vadd.f32 %v956_v2, %v2989_v4  ;;  %v995_v37 = vmax.f32 %v901_v12, 0.0  ;;  %v1011_v43 = vmax.f32 %v965_v18, 0.0 }
 0x12b   : > { %v2447_v13 = vpop.f32.mrf.mxu0  ;;  %v2463_v14 = vpop.f32.mrf.mxu1  ;;  %v3099_v58 = vmul.f32 %v3005_v21, %v992_v28  ;;  %v3102_v62 = vmul.f32 %v3005_v21, %v1008_v33 }
 0x12c   : > { %v914_v30 = vadd.f32 %v2447_v13, %v2989_v4  ;;  %v993_v45 = vmax.f32 %v893_v23, 0.0  ;;  %v3089_v48 = vadd.f32 %v2463_v14, %v2989_v4  ;;  %v1009_v59 = vmax.f32 %v957_v29, 0.0 }
 0x12d   : > { %v905_v24 = vpop.f32.mrf.mxu0  ;;  %v969_v26 = vpop.f32.mrf.mxu1  ;;  %v3105_v63 = vmul.f32 %v3005_v21, %v995_v37  ;;  %v3109_v7 = vmul.f32 %v3005_v21, %v1011_v43 }
 0x12e   : > { %v906_v44 = vadd.f32 %v905_v24, %v2989_v4  ;;  %v970_v49 = vadd.f32 %v969_v26, %v2989_v4  ;;  %v998_v60 = vmax.f32 %v914_v30, 0.0  ;;  %v3114_v12 = vmul.f32 %v3005_v21, %v993_v45 }
 0x12f   : > { %v2448_v38 = vpop.f32.mrf.mxu0  ;;  %v2464_v40 = vpop.f32.mrf.mxu1  ;;  %v1014_v13 = vmax.f32 %v3089_v48, 0.0  ;;  %v3121_v23 = vmul.f32 %v3005_v21, %v1009_v59 }
 0x130   : > { %v981_v52 = vadd.f32 %v2464_v40, %v2989_v4  ;;  %v917_v0 = vadd.f32 %v2448_v38, %v2989_v4  ;;  %v996_v8 = vmax.f32 %v906_v44, 0.0  ;;  %v1012_v14 = vmax.f32 %v970_v49, 0.0 }
 0x131   : > { %v908_v53 = vpop.f32.mrf.mxu0  ;;  %v3093_v54 = vpop.f32.mrf.mxu1  ;;  %v3124_v24 = vmul.f32 %v3005_v21, %v998_v60 }
 0x132   : > { %v1015_v1 = vmax.f32 %v981_v52, 0.0  ;;  %v999_v28 = vmax.f32 %v917_v0, 0.0  ;;  %v3127_v29 = vadd.f32 %v908_v53, %v2989_v4  ;;  %v3132_v40 = vmul.f32 %v3005_v21, %v996_v8 }
 0x133   : > { %v2483_v2 = vpop.f32.mrf.mxu1  ;;  %v2531_v6 = vpop.f32.mrf.mxu0  ;;  %v3138_v49 = vmul.f32 %v3005_v21, %v1012_v14 }
 0x134   : > { %v1257_v9 = vadd.f32 %v2483_v2, %v3008_v25  ;;  %v1648_v10 = vadd.f32 %v2531_v6, %v3015_v35  ;;  %v3118_v16 = vmul.f32 %v3005_v21, %v1015_v1 }
 0x135   : > { %v1248_v17 = vpop.f32.mrf.mxu1  ;;  %v1639_v18 = vpop.f32.mrf.mxu0 }
 0x136   : > { %v1377_v26 = vmax.f32 %v1257_v9, 0.0  ;;  %v1768_v27 = vmax.f32 %v1648_v10, 0.0  ;;  %v1249_v30 = vadd.f32 %v1248_v17, %v3008_v25  ;;  %v1640_v33 = vadd.f32 %v1639_v18, %v3015_v35 }
 0x137   : > { %v2484_v37 = vpop.f32.mrf.mxu1  ;;  %v2532_v38 = vpop.f32.mrf.mxu0  ;;  %v3144_v9 = vmul.f32 %v3005_v21, %v999_v28  ;;  %v997_v10 = vmax.f32 %v3127_v29, 0.0 }
 0x138   : > { %v1840_v43 = vmul.f32 %v3013_v34, %v1377_v26  ;;  %v1260_v44 = vadd.f32 %v2484_v37, %v3008_v25  ;;  %v1651_v45 = vadd.f32 %v2532_v38, %v3015_v35  ;;  %v1375_v52 = vmax.f32 %v1249_v30, 0.0 }
 0x139   : > { %v1766_v53 = vmax.f32 %v1640_v33, 0.0  ;;  %v1251_v59 = vpop.f32.mrf.mxu1  ;;  %v1642_v60 = vpop.f32.mrf.mxu0  ;;  %v1908_v0 = vmul.f32 %v3022_v39, %v1768_v27 }
 0x13a   : > { %v1378_v1 = vmax.f32 %v1260_v44, 0.0  ;;  %v1769_v2 = vmax.f32 %v1651_v45, 0.0  ;;  %v1252_v6 = vadd.f32 %v1251_v59, %v3008_v25  ;;  %v1643_v8 = vadd.f32 %v1642_v60, %v3015_v35 }
 0x13b   : > { %v1838_v14 = vmul.f32 %v3013_v34, %v1375_v52  ;;  %v2487_v17 = vpop.f32.mrf.mxu1  ;;  %v2535_v18 = vpop.f32.mrf.mxu0  ;;  %v1872_v26 = vadd.f32 %v1840_v43, %v3018_v36  ;;  %v1906_v37 = vmul.f32 %v3022_v39, %v1766_v53 }
 0x13c   : > { %v1841_v30 = vmul.f32 %v3013_v34, %v1378_v1  ;;  %v1376_v27 = vmax.f32 %v1252_v6, 0.0  ;;  %v1767_v33 = vmax.f32 %v1643_v8, 0.0  ;;  %v1273_v38 = vadd.f32 %v2487_v17, %v3008_v25 }
 0x13d   : > { %v1664_v44 = vadd.f32 %v2535_v18, %v3015_v35  ;;  %v1264_v28 = vpop.f32.mrf.mxu1  ;;  %v1655_v45 = vpop.f32.mrf.mxu0  ;;  %v1940_v59 = vadd.f32 %v1908_v0, %v1872_v26  ;;  %v1870_v29 = vadd.f32 %v1838_v14, %v3031_v47  ;;  %v1909_v52 = vmul.f32 %v3022_v39, %v1769_v2 }
 0x13e   : > { %v1839_v60 = vmul.f32 %v3013_v34, %v1376_v27  ;;  %v1265_v36 = vadd.f32 %v1264_v28, %v3008_v25  ;;  %v1656_v43 = vadd.f32 %v1655_v45, %v3015_v35  ;;  %v1381_v1 = vmax.f32 %v1273_v38, 0.0 }
 0x13f   : > { %v1772_v6 = vmax.f32 %v1664_v44, 0.0  ;;  %1974 = vadd.xlane.f32.xlu1 %v1940_v59  ;;  %v2488_v53 = vpop.f32.mrf.mxu1  ;;  %v2536_v8 = vpop.f32.mrf.mxu0  ;;  %v1938_v17 = vadd.f32 %v1906_v37, %v1870_v29  ;;  %v1873_v18 = vadd.f32 %v1841_v30, %v3037_v51  ;;  %v1907_v0 = vmul.f32 %v3022_v39, %v1767_v33 }
 0x140   : > { %v1379_v26 = vmax.f32 %v1265_v36, 0.0  ;;  %v1276_v47 = vadd.f32 %v2488_v53, %v3008_v25  ;;  %v1667_v2 = vadd.f32 %v2536_v8, %v3015_v35  ;;  %v1844_v14 = vmul.f32 %v3013_v34, %v1381_v1 }
 0x141   : > { %v1770_v27 = vmax.f32 %v1656_v43, 0.0  ;;  %1970 = vadd.xlane.f32.xlu0 %v1938_v17  ;;  %v1267_v28 = vpop.f32.mrf.mxu1  ;;  %v1658_v38 = vpop.f32.mrf.mxu0  ;;  %v1941_v44 = vadd.f32 %v1909_v52, %v1873_v18  ;;  %v1871_v45 = vadd.f32 %v1839_v60, %v3047_v61  ;;  %v1912_v37 = vmul.f32 %v3022_v39, %v1772_v6 }
 0x142   : > { %v1842_v51 = vmul.f32 %v3013_v34, %v1379_v26  ;;  %v1382_v30 = vmax.f32 %v1276_v47, 0.0  ;;  %v1773_v33 = vmax.f32 %v1667_v2, 0.0  ;;  %v1268_v59 = vadd.f32 %v1267_v28, %v3008_v25 }
 0x143   : > { %v1659_v29 = vadd.f32 %v1658_v38, %v3015_v35  ;;  %1976 = vadd.xlane.f32.xlu1 %v1941_v44  ;;  %v2491_v36 = vpop.f32.mrf.mxu1  ;;  %v2539_v1 = vpop.f32.mrf.mxu0  ;;  %v1939_v43 = vadd.f32 %v1907_v0, %v1871_v45  ;;  %v1876_v53 = vadd.f32 %v1844_v14, %v3053_v5  ;;  %v3170_v52 = vmul.f32 %v3005_v21, %v997_v10 }
 0x144   : > { %v1845_v61 = vmul.f32 %v3013_v34, %v1382_v30  ;;  %v1289_v60 = vadd.f32 %v2491_v36, %v3008_v25  ;;  %v1680_v6 = vadd.f32 %v2539_v1, %v3015_v35  ;;  %v1910_v8 = vmul.f32 %v3022_v39, %v1770_v27 }
 0x145   : > { %v1913_v17 = vmul.f32 %v3022_v39, %v1773_v33  ;;  %v1380_v18 = vmax.f32 %v1268_v59, 0.0  ;;  %v1771_v26 = vmax.f32 %v1659_v29, 0.0  ;;  %1972 = vadd.xlane.f32.xlu0 %v1939_v43  ;;  %v1280_v47 = vpop.f32.mrf.mxu1  ;;  %v1671_v0 = vpop.f32.mrf.mxu0  ;;  %v1944_v45 = vadd.f32 %v1912_v37, %v1876_v53 }
 0x146   : > { %v1385_v2 = vmax.f32 %v1289_v60, 0.0  ;;  %v1776_v5 = vmax.f32 %v1680_v6, 0.0  ;;  %v1281_v10 = vadd.f32 %v1280_v47, %v3008_v25  ;;  %v1672_v14 = vadd.f32 %v1671_v0, %v3015_v35 }
 0x147   : > { %v1843_v28 = vmul.f32 %v3013_v34, %v1380_v18  ;;  %v2492_v38 = vpop.f32.mrf.mxu1  ;;  %v2540_v44 = vpop.f32.mrf.mxu0  ;;  %v1877_v27 = vadd.f32 %v1845_v61, %v3070_v22  ;;  %v1874_v30 = vadd.f32 %v1842_v51, %v3064_v19  ;;  %v1911_v33 = vmul.f32 %v3022_v39, %v1771_v26 }
 0x148   : > { %v1848_v59 = vmul.f32 %v3013_v34, %v1385_v2  ;;  %v1383_v29 = vmax.f32 %v1281_v10, 0.0  ;;  %v1774_v36 = vmax.f32 %v1672_v14, 0.0  ;;  %v1292_v1 = vadd.f32 %v2492_v38, %v3008_v25 }
 0x149   : > { %v1683_v43 = vadd.f32 %v2540_v44, %v3015_v35  ;;  %1982 = vadd.xlane.f32.xlu0 %v1944_v45  ;;  %v1283_v60 = vpop.f32.mrf.mxu1  ;;  %v1674_v6 = vpop.f32.mrf.mxu0  ;;  %v1945_v18 = vadd.f32 %v1913_v17, %v1877_v27  ;;  %v1875_v37 = vadd.f32 %v1843_v28, %v3079_v32  ;;  %v1916_v22 = vmul.f32 %v3022_v39, %v1776_v5 }
 0x14a   : > { %v1846_v19 = vmul.f32 %v3013_v34, %v1383_v29  ;;  %v1284_v51 = vadd.f32 %v1283_v60, %v3008_v25  ;;  %v1675_v53 = vadd.f32 %v1674_v6, %v3015_v35  ;;  %v1386_v61 = vmax.f32 %v1292_v1, 0.0 }
 0x14b   : > { %v1777_v26 = vmax.f32 %v1683_v43, 0.0  ;;  %1984 = vadd.xlane.f32.xlu1 %v1945_v18  ;;  %v2495_v47 = vpop.f32.mrf.mxu1  ;;  %v2543_v0 = vpop.f32.mrf.mxu0  ;;  %v1942_v2 = vadd.f32 %v1910_v8, %v1874_v30  ;;  %v1880_v10 = vadd.f32 %v1848_v59, %v3085_v42  ;;  %v1914_v28 = vmul.f32 %v3022_v39, %v1774_v36 }
 0x14c   : > { %v1384_v14 = vmax.f32 %v1284_v51, 0.0  ;;  %v1775_v17 = vmax.f32 %v1675_v53, 0.0  ;;  %v1305_v32 = vadd.f32 %v2495_v47, %v3008_v25  ;;  %v1696_v5 = vadd.f32 %v2543_v0, %v3015_v35 }
 0x14d   : > { %v1849_v38 = vmul.f32 %v3013_v34, %v1386_v61  ;;  %v1917_v44 = vmul.f32 %v3022_v39, %v1777_v26  ;;  %1978 = vadd.xlane.f32.xlu0 %v1942_v2  ;;  %v1296_v45 = vpop.f32.mrf.mxu1  ;;  %v1687_v27 = vpop.f32.mrf.mxu0  ;;  %v1943_v29 = vadd.f32 %v1911_v33, %v1875_v37  ;;  %v1948_v42 = vadd.f32 %v1916_v22, %v1880_v10 }
 0x14e   : > { %v1847_v8 = vmul.f32 %v3013_v34, %v1384_v14  ;;  %v1389_v30 = vmax.f32 %v1305_v32, 0.0  ;;  %v1878_v59 = vadd.f32 %v1846_v19, %v3099_v58  ;;  %v1780_v1 = vmax.f32 %v1696_v5, 0.0 }
 0x14f   : > { %v1297_v43 = vadd.f32 %v1296_v45, %v3008_v25  ;;  %v1688_v60 = vadd.f32 %v1687_v27, %v3015_v35  ;;  %1980 = vadd.xlane.f32.xlu1 %v1943_v29  ;;  %v2496_v36 = vpop.f32.mrf.mxu1  ;;  %v2544_v6 = vpop.f32.mrf.mxu0  ;;  %v1881_v18 = vadd.f32 %v1849_v38, %v3105_v63  ;;  %v1915_v51 = vmul.f32 %v3022_v39, %v1775_v17 }
 0x150   : > { %v1852_v33 = vmul.f32 %v3013_v34, %v1389_v30  ;;  %v1308_v37 = vadd.f32 %v2496_v36, %v3008_v25  ;;  %v1699_v22 = vadd.f32 %v2544_v6, %v3015_v35  ;;  %v1879_v47 = vadd.f32 %v1847_v8, %v3114_v12 }
 0x151   : > { %v1387_v53 = vmax.f32 %v1297_v43, 0.0  ;;  %v1778_v58 = vmax.f32 %v1688_v60, 0.0  ;;  %1990 = vadd.xlane.f32.xlu0 %v1948_v42  ;;  %v1299_v19 = vpop.f32.mrf.mxu1  ;;  %v1690_v61 = vpop.f32.mrf.mxu0  ;;  %v1949_v26 = vadd.f32 %v1917_v44, %v1881_v18  ;;  %v1920_v14 = vmul.f32 %v3022_v39, %v1780_v1 }
 0x152   : > { %v1390_v0 = vmax.f32 %v1308_v37, 0.0  ;;  %v1781_v2 = vmax.f32 %v1699_v22, 0.0  ;;  %v1300_v63 = vadd.f32 %v1299_v19, %v3008_v25  ;;  %v1691_v10 = vadd.f32 %v1690_v61, %v3015_v35 }
 0x153   : > { %v1850_v17 = vmul.f32 %v3013_v34, %v1387_v53  ;;  %1992 = vadd.xlane.f32.xlu1 %v1949_v26  ;;  %v2499_v32 = vpop.f32.mrf.mxu1  ;;  %v2547_v5 = vpop.f32.mrf.mxu0  ;;  %v1946_v38 = vadd.f32 %v1914_v28, %v1878_v59  ;;  %v1884_v45 = vadd.f32 %v1852_v33, %v3124_v24  ;;  %v1918_v44 = vmul.f32 %v3022_v39, %v1778_v58 }
 0x154   : > { %v1853_v12 = vmul.f32 %v3013_v34, %v1390_v0  ;;  %v1388_v27 = vmax.f32 %v1300_v63, 0.0  ;;  %v1947_v29 = vadd.f32 %v1915_v51, %v1879_v47  ;;  %v1921_v8 = vmul.f32 %v3022_v39, %v1781_v2 }
 0x155   : > { %v1779_v30 = vmax.f32 %v1691_v10, 0.0  ;;  %v1321_v42 = vadd.f32 %v2499_v32, %v3008_v25  ;;  %v1712_v1 = vadd.f32 %v2547_v5, %v3015_v35  ;;  %1986 = vadd.xlane.f32.xlu0 %v1946_v38  ;;  %v1312_v43 = vpop.f32.mrf.mxu1  ;;  %v1703_v60 = vpop.f32.mrf.mxu0  ;;  %v1882_v36 = vadd.f32 %v1850_v17, %v3132_v40 }
 0x156   : > { %v1851_v28 = vmul.f32 %v3013_v34, %v1388_v27  ;;  %v1313_v24 = vadd.f32 %v1312_v43, %v3008_v25  ;;  %v1704_v59 = vadd.f32 %v1703_v60, %v3015_v35  ;;  %v1952_v37 = vadd.f32 %v1920_v14, %v1884_v45 }
 0x157   : > { %v1393_v6 = vmax.f32 %v1321_v42, 0.0  ;;  %v1784_v18 = vmax.f32 %v1712_v1, 0.0  ;;  %1988 = vadd.xlane.f32.xlu1 %v1947_v29  ;;  %v2500_v51 = vpop.f32.mrf.mxu1  ;;  %v2548_v33 = vpop.f32.mrf.mxu0  ;;  %v1885_v22 = vadd.f32 %v1853_v12, %v3144_v9  ;;  %v1919_v26 = vmul.f32 %v3022_v39, %v1779_v30 }
 0x158   : > { %v1391_v53 = vmax.f32 %v1313_v24, 0.0  ;;  %v1782_v58 = vmax.f32 %v1704_v59, 0.0  ;;  %v1324_v19 = vadd.f32 %v2500_v51, %v3008_v25  ;;  %v1715_v61 = vadd.f32 %v2548_v33, %v3015_v35 }
 0x159   : > { %v1856_v47 = vmul.f32 %v3013_v34, %v1393_v6  ;;  %1998 = vadd.xlane.f32.xlu0 %v1952_v37  ;;  %v1315_v40 = vpop.f32.mrf.mxu1  ;;  %v1706_v0 = vpop.f32.mrf.mxu0  ;;  %v1953_v2 = vadd.f32 %v1921_v8, %v1885_v22  ;;  %v1883_v63 = vadd.f32 %v1851_v28, %v3170_v52  ;;  %v1924_v10 = vmul.f32 %v3022_v39, %v1784_v18 }
 0x15a   : > { %v1854_v9 = vmul.f32 %v3013_v34, %v1391_v53  ;;  %v1394_v14 = vmax.f32 %v1324_v19, 0.0  ;;  %v1950_v17 = vadd.f32 %v1918_v44, %v1882_v36  ;;  %v1785_v32 = vmax.f32 %v1715_v61, 0.0 }
 0x15b   : > { %v1316_v5 = vadd.f32 %v1315_v40, %v3008_v25  ;;  %v1707_v38 = vadd.f32 %v1706_v0, %v3015_v35  ;;  %2000 = vadd.xlane.f32.xlu1 %v1953_v2  ;;  %v2503_v45 = vpop.f32.mrf.mxu1  ;;  %v2551_v12 = vpop.f32.mrf.mxu0  ;;  %v1888_v27 = vadd.f32 %v1856_v47, %v3028_v46  ;;  %v1922_v29 = vmul.f32 %v3022_v39, %v1782_v58 }
 0x15c   : > { %v1857_v52 = vmul.f32 %v3013_v34, %v1394_v14  ;;  %v1337_v8 = vadd.f32 %v2503_v45, %v3008_v25  ;;  %v1728_v30 = vadd.f32 %v2551_v12, %v3015_v35  ;;  %v1951_v60 = vadd.f32 %v1919_v26, %v1883_v63 }
 0x15d   : > { %v1392_v42 = vmax.f32 %v1316_v5, 0.0  ;;  %v1783_v44 = vmax.f32 %v1707_v38, 0.0  ;;  %1994 = vadd.xlane.f32.xlu0 %v1950_v17  ;;  %v1328_v1 = vpop.f32.mrf.mxu1  ;;  %v1719_v43 = vpop.f32.mrf.mxu0  ;;  %v1886_v28 = vadd.f32 %v1854_v9, %v3034_v50  ;;  %v1925_v6 = vmul.f32 %v3022_v39, %v1785_v32 }
 0x15e   : > { %v1397_v24 = vmax.f32 %v1337_v8, 0.0  ;;  %v1788_v59 = vmax.f32 %v1728_v30, 0.0  ;;  %v1329_v46 = vadd.f32 %v1328_v1, %v3008_v25  ;;  %v1720_v36 = vadd.f32 %v1719_v43, %v3015_v35 }
 0x15f   : > { %v1855_v18 = vmul.f32 %v3013_v34, %v1392_v42  ;;  %1996 = vadd.xlane.f32.xlu1 %v1951_v60  ;;  %v2504_v51 = vpop.f32.mrf.mxu1  ;;  %v2552_v33 = vpop.f32.mrf.mxu0  ;;  %v1956_v37 = vadd.f32 %v1924_v10, %v1888_v27  ;;  %v1889_v22 = vadd.f32 %v1857_v52, %v3042_v56  ;;  %v1923_v53 = vmul.f32 %v3022_v39, %v1783_v44 }
 0x160   : > { %v1860_v50 = vmul.f32 %v3013_v34, %v1397_v24  ;;  %v1395_v58 = vmax.f32 %v1329_v46, 0.0  ;;  %v1786_v19 = vmax.f32 %v1720_v36, 0.0  ;;  %v1340_v61 = vadd.f32 %v2504_v51, %v3008_v25 }
 0x161   : > { %v1731_v26 = vadd.f32 %v2552_v33, %v3015_v35  ;;  %2006 = vadd.xlane.f32.xlu0 %v1956_v37  ;;  %v1331_v47 = vpop.f32.mrf.mxu1  ;;  %v1722_v40 = vpop.f32.mrf.mxu0  ;;  %v1957_v0 = vadd.f32 %v1925_v6, %v1889_v22  ;;  %v1887_v2 = vadd.f32 %v1855_v18, %v3050_v3  ;;  %v1928_v63 = vmul.f32 %v3022_v39, %v1788_v59 }
 0x162   : > { %v1332_v56 = vadd.f32 %v1331_v47, %v3008_v25  ;;  %v1723_v10 = vadd.f32 %v1722_v40, %v3015_v35  ;;  %v1954_v9 = vadd.f32 %v1922_v29, %v1886_v28  ;;  %v1858_v14 = vmul.f32 %v3013_v34, %v1395_v58 }
 0x163   : > { %v1398_v17 = vmax.f32 %v1340_v61, 0.0  ;;  %v1789_v32 = vmax.f32 %v1731_v26, 0.0  ;;  %2008 = vadd.xlane.f32.xlu1 %v1957_v0  ;;  %v2507_v5 = vpop.f32.mrf.mxu1  ;;  %v2555_v38 = vpop.f32.mrf.mxu0  ;;  %v1892_v45 = vadd.f32 %v1860_v50, %v3060_v15  ;;  %v3254_v12 = vadd.f32 %v3093_v54, %v2989_v4 }
 0x164   : > { %v1396_v3 = vmax.f32 %v1332_v56, 0.0  ;;  %v1353_v27 = vadd.f32 %v2507_v5, %v3008_v25  ;;  %v1744_v52 = vadd.f32 %v2555_v38, %v3015_v35  ;;  %v1926_v29 = vmul.f32 %v3022_v39, %v1786_v19 }
 0x165   : > { %v1861_v8 = vmul.f32 %v3013_v34, %v1398_v17  ;;  %v1787_v30 = vmax.f32 %v1723_v10, 0.0  ;;  %2002 = vadd.xlane.f32.xlu0 %v1954_v9  ;;  %v1344_v42 = vpop.f32.mrf.mxu1  ;;  %v1735_v44 = vpop.f32.mrf.mxu0  ;;  %v1955_v1 = vadd.f32 %v1923_v53, %v1887_v2  ;;  %v1929_v15 = vmul.f32 %v3022_v39, %v1789_v32 }
 0x166   : > { %v1859_v43 = vmul.f32 %v3013_v34, %v1396_v3  ;;  %v1401_v4 = vmax.f32 %v1353_v27, 0.0  ;;  %v1960_v54 = vadd.f32 %v1928_v63, %v1892_v45  ;;  %v1792_v60 = vmax.f32 %v1744_v52, 0.0 }
 0x167   : > { %v1345_v28 = vadd.f32 %v1344_v42, %v3008_v25  ;;  %2004 = vadd.xlane.f32.xlu1 %v1955_v1  ;;  %v2508_v24 = vpop.f32.mrf.mxu1  ;;  %v2556_v59 = vpop.f32.mrf.mxu0  ;;  %v1893_v46 = vadd.f32 %v1861_v8, %v3076_v31  ;;  %v1890_v36 = vadd.f32 %v1858_v14, %v3067_v20  ;;  %v1736_v18 = vadd.f32 %v1735_v44, %v3015_v35 }
 0x168   : > { %v1864_v6 = vmul.f32 %v3013_v34, %v1401_v4  ;;  %v1356_v51 = vadd.f32 %v2508_v24, %v3008_v25  ;;  %v1747_v33 = vadd.f32 %v2556_v59, %v3015_v35  ;;  %v1927_v37 = vmul.f32 %v3022_v39, %v1787_v30 }
 0x169   : > { %v1399_v22 = vmax.f32 %v1345_v28, 0.0  ;;  %2014 = vadd.xlane.f32.xlu0 %v1960_v54  ;;  %v1347_v53 = vpop.f32.mrf.mxu1  ;;  %v1738_v50 = vpop.f32.mrf.mxu0  ;;  %v1961_v58 = vadd.f32 %v1929_v15, %v1893_v46  ;;  %v1891_v19 = vadd.f32 %v1859_v43, %v3082_v41  ;;  %v1932_v47 = vmul.f32 %v3022_v39, %v1792_v60 }
 0x16a   : > { %v1402_v31 = vmax.f32 %v1356_v51, 0.0  ;;  %v1793_v61 = vmax.f32 %v1747_v33, 0.0  ;;  %v1348_v20 = vadd.f32 %v1347_v53, %v3008_v25  ;;  %v1739_v26 = vadd.f32 %v1738_v50, %v3015_v35 }
 0x16b   : > { %v1862_v40 = vmul.f32 %v3013_v34, %v1399_v22  ;;  %2016 = vadd.xlane.f32.xlu1 %v1961_v58  ;;  %v2511_v0 = vpop.f32.mrf.mxu1  ;;  %v2559_v2 = vpop.f32.mrf.mxu0  ;;  %v1958_v63 = vadd.f32 %v1926_v29, %v1890_v36  ;;  %v1896_v56 = vadd.f32 %v1864_v6, %v3096_v55  ;;  %v1013_v10 = vmax.f32 %v3254_v12, 0.0 }
 0x16c   : > { %v1790_v9 = vmax.f32 %v1736_v18, 0.0  ;;  %v1865_v41 = vmul.f32 %v3013_v34, %v1402_v31  ;;  %v1400_v14 = vmax.f32 %v1348_v20, 0.0  ;;  %v1933_v17 = vmul.f32 %v3022_v39, %v1793_v61 }
 0x16d   : > { %v1791_v32 = vmax.f32 %v1739_v26, 0.0  ;;  %v1369_v5 = vadd.f32 %v2511_v0, %v3008_v25  ;;  %2010 = vadd.xlane.f32.xlu0 %v1958_v63  ;;  %v1360_v38 = vpop.f32.mrf.mxu1  ;;  %v1751_v45 = vpop.f32.mrf.mxu0  ;;  %v1959_v3 = vadd.f32 %v1927_v37, %v1891_v19  ;;  %v1760_v52 = vadd.f32 %v2559_v2, %v3015_v35 }
 0x16e   : > { %v1863_v27 = vmul.f32 %v3013_v34, %v1400_v14  ;;  %v1361_v55 = vadd.f32 %v1360_v38, %v3008_v25  ;;  %v1752_v12 = vadd.f32 %v1751_v45, %v3015_v35  ;;  %v1964_v42 = vadd.f32 %v1932_v47, %v1896_v56 }
 0x16f   : > { %v1405_v29 = vmax.f32 %v1369_v5, 0.0  ;;  %2012 = vadd.xlane.f32.xlu1 %v1959_v3  ;;  %v2512_v8 = vpop.f32.mrf.mxu1  ;;  %v2560_v30 = vpop.f32.mrf.mxu0  ;;  %v1897_v44 = vadd.f32 %v1865_v41, %v3109_v7  ;;  %v1894_v1 = vadd.f32 %v1862_v40, %v3102_v62  ;;  %v1930_v60 = vmul.f32 %v3022_v39, %v1790_v9 }
 0x170   : > { %v1403_v15 = vmax.f32 %v1361_v55, 0.0  ;;  %v1794_v43 = vmax.f32 %v1752_v12, 0.0  ;;  %v1372_v4 = vadd.f32 %v2512_v8, %v3008_v25  ;;  %v1763_v54 = vadd.f32 %v2560_v30, %v3015_v35 }
 0x171   : > { %v1931_v28 = vmul.f32 %v3022_v39, %v1791_v32  ;;  %2022 = vadd.xlane.f32.xlu0 %v1964_v42  ;;  %v1363_v24 = vpop.f32.mrf.mxu1  ;;  %v1754_v59 = vpop.f32.mrf.mxu0  ;;  %v1965_v46 = vadd.f32 %v1933_v17, %v1897_v44  ;;  %v1895_v36 = vadd.f32 %v1863_v27, %v3121_v23  ;;  %v1796_v6 = vmax.f32 %v1760_v52, 0.0 }
 0x172   : > { %v1866_v7 = vmul.f32 %v3013_v34, %v1403_v15  ;;  %v1406_v62 = vmax.f32 %v1372_v4, 0.0  ;;  %v1797_v18 = vmax.f32 %v1763_v54, 0.0  ;;  %v1868_v51 = vmul.f32 %v3013_v34, %v1405_v29 }
 0x173   : > { %v1364_v33 = vadd.f32 %v1363_v24, %v3008_v25  ;;  %v1755_v37 = vadd.f32 %v1754_v59, %v3015_v35  ;;  %2024 = vadd.xlane.f32.xlu1 %v1965_v46  ;;  %v1962_v22 = vadd.f32 %v1930_v60, %v1894_v1  ;;  %v1934_v53 = vmul.f32 %v3022_v39, %v1794_v43 }
 0x174   : > { %v1869_v50 = vmul.f32 %v3013_v34, %v1406_v62  ;;  %v1937_v58 = vmul.f32 %v3022_v39, %v1797_v18  ;;  %v1898_v23 = vadd.f32 %v1866_v7, %v3138_v49  ;;  %v1832_v19 = vmul.f32 %v3005_v21, %v1014_v13 }
 0x175   : > { %v1404_v31 = vmax.f32 %v1364_v33, 0.0  ;;  %v1795_v61 = vmax.f32 %v1755_v37, 0.0  ;;  %2018 = vadd.xlane.f32.xlu0 %v1962_v22  ;;  %v1963_v25 = vadd.f32 %v1931_v28, %v1895_v36  ;;  %v1831_v26 = vmul.f32 %v3005_v21, %v1013_v10 }
 0x176   : > { %v1966_v20 = vadd.f32 %v1934_v53, %v1898_v23  ;;  %v1901_v35 = vadd.f32 %v1869_v50, %v3118_v16  ;;  %v1936_v47 = vmul.f32 %v3022_v39, %v1796_v6  ;;  %v1900_v49 = vadd.f32 %v1868_v51, %v1832_v19 }
 0x177   : > { %v1867_v40 = vmul.f32 %v3013_v34, %v1404_v31  ;;  %2020 = vadd.xlane.f32.xlu1 %v1963_v25  ;;  %v1935_v48 = vmul.f32 %v3022_v39, %v1795_v61  ;;  %v2036_v21 = vsub.s32 3, %v2983_v57 }
 0x178   : > { %v1969_v0 = vadd.f32 %v1937_v58, %v1901_v35  ;;  %v1968_v63 = vadd.f32 %v1936_v47, %v1900_v49 }
 0x179   : > { %2026 = vadd.xlane.f32.xlu0 %v1966_v20  ;;  %v1899_v13 = vadd.f32 %v1867_v40, %v1831_v26  ;;  %v3311_v34 = vrot.slane %v2996_v11, %v2036_v21 }
 0x17b   : > { %v1967_v2 = vadd.f32 %v1935_v48, %v1899_v13 }
 0x17d   : > { %2028 = vadd.xlane.f32.xlu1 %v1967_v2  ;;  %2030 = vadd.xlane.f32.xlu0 %v1968_v63 }
 0x181   : > { %2032 = vadd.xlane.f32.xlu1 %v1969_v0 }
 0x1c8   : > { %v1975_v39 = vpop.xlane.xlu1 %1974 }
 0x1c9   : > { %v2040_v16 = vadd.f32 %v3311_v34, %v1975_v39 }
 0x1ca   : > { %v1971_v56 = vpop.xlane.xlu0 %1970 }
 0x1cb   : > { %2073 = vst.msk [vmem:[%s3316_s27 + $0x10] sm:$0xff] %vm2070_vm0, %v2040_v16  ;;  %v2038_v57 = vadd.f32 %v3311_v34, %v1971_v56 }
 0x1cc   : > { %v1977_v11 = vpop.xlane.xlu1 %1976 }
 0x1cd   : > { %2071 = vst.msk [vmem:[%s3316_s27] sm:$0xff] %vm2070_vm0, %v2038_v57  ;;  %v2041_v10 = vadd.f32 %v3311_v34, %v1977_v11 }
 0x1ce   : > { %v1973_v9 = vpop.xlane.xlu0 %1972 }
 0x1cf   : > { %2074 = vst.msk [vmem:[%s3316_s27 + $0x18] sm:$0xff] %vm2070_vm0, %v2041_v10  ;;  %v2039_v41 = vadd.f32 %v3311_v34, %v1973_v9 }
 0x1d1   : > { %2072 = vst.msk [vmem:[%s3316_s27 + $0x8] sm:$0xff] %vm2070_vm0, %v2039_v41 }
 0x1d2   : > { %v1983_v14 = vpop.xlane.xlu0 %1982 }
 0x1d3   : > { %v2044_v17 = vadd.f32 %v3311_v34, %v1983_v14 }
 0x1d4   : > { %v1985_v32 = vpop.xlane.xlu1 %1984 }
 0x1d5   : > { %2077 = vst.msk [vmem:[%s3316_s27 + $0x30] sm:$0xff] %vm2070_vm0, %v2044_v17  ;;  %v2045_v5 = vadd.f32 %v3311_v34, %v1985_v32 }
 0x1d6   : > { %v1979_v38 = vpop.xlane.xlu0 %1978 }
 0x1d7   : > { %2078 = vst.msk [vmem:[%s3316_s27 + $0x38] sm:$0xff] %vm2070_vm0, %v2045_v5  ;;  %v2042_v45 = vadd.f32 %v3311_v34, %v1979_v38 }
 0x1d8   : > { %v1981_v3 = vpop.xlane.xlu1 %1980 }
 0x1d9   : > { %2075 = vst.msk [vmem:[%s3316_s27 + $0x20] sm:$0xff] %vm2070_vm0, %v2042_v45  ;;  %v2043_v27 = vadd.f32 %v3311_v34, %v1981_v3 }
 0x1da   : > { %v1991_v52 = vpop.xlane.xlu0 %1990 }
 0x1db   : > { %2076 = vst.msk [vmem:[%s3316_s27 + $0x28] sm:$0xff] %vm2070_vm0, %v2043_v27  ;;  %v2048_v55 = vadd.f32 %v3311_v34, %v1991_v52 }
 0x1dc   : > { %v1993_v12 = vpop.xlane.xlu1 %1992 }
 0x1dd   : > { %2081 = vst.msk [vmem:[%s3316_s27 + $0x50] sm:$0xff] %vm2070_vm0, %v2048_v55  ;;  %v2049_v29 = vadd.f32 %v3311_v34, %v1993_v12 }
 0x1de   : > { %v1987_v8 = vpop.xlane.xlu0 %1986 }
 0x1df   : > { %2082 = vst.msk [vmem:[%s3316_s27 + $0x58] sm:$0xff] %vm2070_vm0, %v2049_v29  ;;  %v2046_v30 = vadd.f32 %v3311_v34, %v1987_v8 }
 0x1e0   : > { %v1989_v42 = vpop.xlane.xlu1 %1988 }
 0x1e1   : > { %2079 = vst.msk [vmem:[%s3316_s27 + $0x40] sm:$0xff] %vm2070_vm0, %v2046_v30  ;;  %v2047_v44 = vadd.f32 %v3311_v34, %v1989_v42 }
 0x1e2   : > { %v1999_v1 = vpop.xlane.xlu0 %1998 }
 0x1e3   : > { %2080 = vst.msk [vmem:[%s3316_s27 + $0x48] sm:$0xff] %vm2070_vm0, %v2047_v44  ;;  %v2052_v15 = vadd.f32 %v3311_v34, %v1999_v1 }
 0x1e4   : > { %v2001_v43 = vpop.xlane.xlu1 %2000 }
 0x1e5   : > { %2085 = vst.msk [vmem:[%s3316_s27 + $0x70] sm:$0xff] %vm2070_vm0, %v2052_v15  ;;  %v2053_v4 = vadd.f32 %v3311_v34, %v2001_v43 }
 0x1e6   : > { %v1995_v54 = vpop.xlane.xlu0 %1994 }
 0x1e7   : > { %2086 = vst.msk [vmem:[%s3316_s27 + $0x78] sm:$0xff] %vm2070_vm0, %v2053_v4  ;;  %v2050_v60 = vadd.f32 %v3311_v34, %v1995_v54 }
 0x1e8   : > { %v1997_v28 = vpop.xlane.xlu1 %1996 }
 0x1e9   : > { %2083 = vst.msk [vmem:[%s3316_s27 + $0x60] sm:$0xff] %vm2070_vm0, %v2050_v60  ;;  %v2051_v24 = vadd.f32 %v3311_v34, %v1997_v28 }
 0x1ea   : > { %v2007_v59 = vpop.xlane.xlu0 %2006 }
 0x1eb   : > { %2084 = vst.msk [vmem:[%s3316_s27 + $0x68] sm:$0xff] %vm2070_vm0, %v2051_v24  ;;  %v2056_v46 = vadd.f32 %v3311_v34, %v2007_v59 }
 0x1ec   : > { %v2009_v36 = vpop.xlane.xlu1 %2008 }
 0x1ed   : > { %2089 = vst.msk [vmem:[%s3316_s27 + $0x90] sm:$0xff] %vm2070_vm0, %v2056_v46  ;;  %v2057_v6 = vadd.f32 %v3311_v34, %v2009_v36 }
 0x1ee   : > { %v2003_v7 = vpop.xlane.xlu0 %2002 }
 0x1ef   : > { %2090 = vst.msk [vmem:[%s3316_s27 + $0x98] sm:$0xff] %vm2070_vm0, %v2057_v6  ;;  %v2054_v62 = vadd.f32 %v3311_v34, %v2003_v7 }
 0x1f0   : > { %v2005_v18 = vpop.xlane.xlu1 %2004 }
 0x1f1   : > { %2087 = vst.msk [vmem:[%s3316_s27 + $0x80] sm:$0xff] %vm2070_vm0, %v2054_v62  ;;  %v2055_v51 = vadd.f32 %v3311_v34, %v2005_v18 }
 0x1f2   : > { %v2015_v33 = vpop.xlane.xlu0 %2014 }
 0x1f3   : > { %2088 = vst.msk [vmem:[%s3316_s27 + $0x88] sm:$0xff] %vm2070_vm0, %v2055_v51  ;;  %v2060_v37 = vadd.f32 %v3311_v34, %v2015_v33 }
 0x1f4   : > { %v2017_v22 = vpop.xlane.xlu1 %2016 }
 0x1f5   : > { %2093 = vst.msk [vmem:[%s3316_s27 + $0xb0] sm:$0xff] %vm2070_vm0, %v2060_v37  ;;  %v2061_v53 = vadd.f32 %v3311_v34, %v2017_v22 }
 0x1f6   : > { %v2011_v50 = vpop.xlane.xlu0 %2010 }
 0x1f7   : > { %2094 = vst.msk [vmem:[%s3316_s27 + $0xb8] sm:$0xff] %vm2070_vm0, %v2061_v53  ;;  %v2058_v58 = vadd.f32 %v3311_v34, %v2011_v50 }
 0x1f8   : > { %v2013_v23 = vpop.xlane.xlu1 %2012 }
 0x1f9   : > { %2091 = vst.msk [vmem:[%s3316_s27 + $0xa0] sm:$0xff] %vm2070_vm0, %v2058_v58  ;;  %v2059_v19 = vadd.f32 %v3311_v34, %v2013_v23 }
 0x1fa   : > { %v2023_v31 = vpop.xlane.xlu0 %2022 }
 0x1fb   : > { %2092 = vst.msk [vmem:[%s3316_s27 + $0xa8] sm:$0xff] %vm2070_vm0, %v2059_v19  ;;  %v2064_v61 = vadd.f32 %v3311_v34, %v2023_v31 }
 0x1fc   : > { %v2025_v25 = vpop.xlane.xlu1 %2024 }
 0x1fd   : > { %2097 = vst.msk [vmem:[%s3316_s27 + $0xd0] sm:$0xff] %vm2070_vm0, %v2064_v61  ;;  %v2065_v20 = vadd.f32 %v3311_v34, %v2025_v25 }
 0x1fe   : > { %v2019_v35 = vpop.xlane.xlu0 %2018 }
 0x1ff   : > { %2098 = vst.msk [vmem:[%s3316_s27 + $0xd8] sm:$0xff] %vm2070_vm0, %v2065_v20  ;;  %v2062_v26 = vadd.f32 %v3311_v34, %v2019_v35 }
 0x200   : > { %v2021_v47 = vpop.xlane.xlu1 %2020 }
 0x201   : > { %2095 = vst.msk [vmem:[%s3316_s27 + $0xc0] sm:$0xff] %vm2070_vm0, %v2062_v26  ;;  %v2063_v40 = vadd.f32 %v3311_v34, %v2021_v47 }
 0x202   : > { %v2027_v49 = vpop.xlane.xlu0 %2026 }
 0x203   : > { %2096 = vst.msk [vmem:[%s3316_s27 + $0xc8] sm:$0xff] %vm2070_vm0, %v2063_v40  ;;  %v2066_v0 = vadd.f32 %v3311_v34, %v2027_v49 }
 0x205   : > { %2099 = vst.msk [vmem:[%s3316_s27 + $0xe0] sm:$0xff] %vm2070_vm0, %v2066_v0 }
 0x206   : > { %v2029_v48 = vpop.xlane.xlu1 %2028  ;;  %v2031_v13 = vpop.xlane.xlu0 %2030 }
 0x207   : > { %v2067_v2 = vadd.f32 %v3311_v34, %v2029_v48  ;;  %v2068_v63 = vadd.f32 %v3311_v34, %v2031_v13 }
 0x209   : > { %2100 = vst.msk [vmem:[%s3316_s27 + $0xe8] sm:$0xff] %vm2070_vm0, %v2067_v2  ;;  %2101 = vst.msk [vmem:[%s3316_s27 + $0xf0] sm:$0xff] %vm2070_vm0, %v2068_v63 }
 0x20a   : > { %v2033_v21 = vpop.xlane.xlu1 %2032 }
 0x20b   : > { %v2069_v39 = vadd.f32 %v3311_v34, %v2033_v21 }
 0x20d   : > { %2102 = vst.msk [vmem:[%s3316_s27 + $0xf8] sm:$0xff] %vm2070_vm0, %v2069_v39 }
 0x20e PF: > { %p11_p9 = scmp.ge.s32.totalorder %s2741_s19, 4   ;;  %s3429_s15 = smov %s2693_s16 }
 0x20f   : > { %s3430_s16 = smov %s2750_s22  ;;  %s3431_s17 = smov %s2741_s19 }
 0x210   :  { %13 = sbr.rel (!%p11_p9) target bundleno = 2 (0x2), region = 116 }

</bundles_post_ra>
